<compile_context>
chip_gen: v7x
topology: tpu7x:2x2x1
jax: 0.10.0
libtpu: 0.0.40
codegen_flags: <defaults>
</compile_context>

<pallas_src>
import functools

import jax
import jax.numpy as jnp
from jax.experimental import pallas as pl
from jax.experimental.pallas import tpu as pltpu


# ----------------------------------------------------------------------------
# Pallas kernel (fused conv1+BN1+ReLU -> conv2+BN2 -> +x -> ReLU)
# ----------------------------------------------------------------------------
def _basic_block_kernel(x_ref, w1_ref, b1_ref, w2_ref, b2_ref, o_ref, tap_ref,
                        *, H, W):
    """Fused BasicBlock forward on one (C, L) slab, L = images_per_step * H*W.

    x_ref  : (C, L)   f32   channels on sublanes, flat (n, h, w) on lanes
    w1_ref : (C, 9C)  bf16  conv1 taps stacked along K, BN1 scale folded in
    b1_ref : (C, 1)   f32   folded BN1 bias
    w2_ref : (C, 9C)  bf16  conv2 taps stacked along K, BN2 scale folded in
    b2_ref : (C, 1)   f32   folded BN2 bias
    o_ref  : (C, L)         output
    tap_ref: (9C, L)  bf16  VMEM scratch holding the 9 shifted+masked taps
    """
    HW = H * W
    C = x_ref.shape[0]
    L = x_ref.shape[1]

    x = x_ref[...].astype(jnp.float32)

    # Lane-only boundary state, built once at (1, L) and broadcast (does not
    # scale vreg pressure with C).
    lane = jax.lax.broadcasted_iota(jnp.int32, (1, L), 1)
    p = (jnp.bitwise_and(lane, HW - 1) if (HW & (HW - 1)) == 0
         else jax.lax.rem(lane, HW))                    # position inside its image
    col = (jnp.bitwise_and(p, W - 1) if (W & (W - 1)) == 0
           else jax.lax.rem(p, W))
    not_top = p >= W
    not_bot = p < (H - 1) * W
    not_left = col >= 1
    not_right = col < (W - 1)

    taps = []                                           # (lane shift d, mask|None)
    for dh in (-1, 0, 1):
        for dw in (-1, 0, 1):
            conds = []
            if dh == -1:
                conds.append(not_top)
            if dh == 1:
                conds.append(not_bot)
            if dw == -1:
                conds.append(not_left)
            if dw == 1:
                conds.append(not_right)
            mask = None
            for c in conds:
                mask = c if mask is None else jnp.logical_and(mask, c)
            taps.append((dh * W + dw, mask))

    def stage_taps(v):
        # v: (C, L) f32.  Stack the 9 shifted + masked taps along the contraction
        # (sublane) axis of the scratch, in bf16.  pltpu.roll is an XLU lane
        # rotation; the wrap-around lanes at image seams are exactly the lanes the
        # boundary masks zero out (each lane block holds whole images).
        for t, (d, mask) in enumerate(taps):
            sh = v if d == 0 else pltpu.roll(v, shift=(-d) % L, axis=1)
            if mask is not None:
                sh = jnp.where(mask, sh, 0.0)
            tap_ref[pl.ds(t * C, C), :] = sh.astype(tap_ref.dtype)

    def conv(w_ref, b_ref):
        # ONE MXU matmul per conv: (C, 9C) x (9C, L), f32 accumulation.
        return (jnp.dot(w_ref[...], tap_ref[...],
                        preferred_element_type=jnp.float32)
                + b_ref[...].astype(jnp.float32))

    stage_taps(x)
    h = jnp.maximum(conv(w1_ref, b1_ref), 0.0)          # ReLU(BN1(conv1(x)))
    stage_taps(h)
    y = x + conv(w2_ref, b2_ref)                        # identity + BN2(conv2(h))
    o_ref[...] = jnp.maximum(y, 0.0).astype(o_ref.dtype)


# ----------------------------------------------------------------------------
# Wrapper
# ----------------------------------------------------------------------------
def _fold_bn(gamma, beta, running_mean, running_var, eps=1e-5):
    scale = gamma / jnp.sqrt(running_var + eps)
    bias = beta - running_mean * scale
    return scale, bias


def _fold_conv_bn_stacked(w_hwio, scale, cp, dtype):
    """HWIO (3,3,Cin,Cout) * BN scale -> stacked-tap matrix (cp, 9*cp).

    Row/column order matches the kernel's scratch layout: tap t = kh*3+kw occupies
    contraction rows [t*cp, (t+1)*cp).  Padded channels get zero weights.
    """
    cin, cout = w_hwio.shape[2], w_hwio.shape[3]
    w = (w_hwio * scale[None, None, None, :]).astype(jnp.float32)
    w = jnp.transpose(w, (3, 0, 1, 2))                  # (Cout, kh, kw, Cin)
    w = jnp.pad(w, ((0, cp - cout), (0, 0), (0, 0), (0, cp - cin)))
    return w.reshape(cp, 9 * cp).astype(dtype)


def _pick_images_per_step(N, HW, target_lanes=4096):
    # Fold several whole images into the lane dimension of one grid step.
    # TODO(synk): pad HW up to a multiple of 128 (and row-tile with halo) for
    # production spatial sizes like 56x56; here we fall back to one full block.
    if HW % 128 != 0:
        return N
    nb = max(1, min(N, max(1, target_lanes // HW)))
    while N % nb:
        nb -= 1
    return nb


def basic_block_forward(x_nchw, params, *, compute_dtype=jnp.bfloat16):
    """Pallas BasicBlock forward. Input/output NCHW (PyTorch convention)."""
    N, C, H, W = x_nchw.shape
    HW = H * W

    # Pad channels to the sublane-packing quantum of the MXU operand dtype so all
    # scratch stores are tile-aligned (16 for bf16, 8 for f32); no-op for prod C.
    quantum = 8 * (4 // jnp.dtype(compute_dtype).itemsize)
    cp = -(-C // quantum) * quantum

    s1, b1 = _fold_bn(params["gamma1"], params["beta1"],
                      params["mean1"], params["var1"])
    s2, b2 = _fold_bn(params["gamma2"], params["beta2"],
                      params["mean2"], params["var2"])
    w1_s = _fold_conv_bn_stacked(params["w1"], s1, cp, compute_dtype)   # (cp, 9cp)
    w2_s = _fold_conv_bn_stacked(params["w2"], s2, cp, compute_dtype)   # (cp, 9cp)
    b1_c = jnp.pad(b1, (0, cp - C)).reshape(cp, 1).astype(jnp.float32)
    b2_c = jnp.pad(b2, (0, cp - C)).reshape(cp, 1).astype(jnp.float32)

    # Lane-dense slab layout: channels on sublanes, flattened (n, h, w) on lanes.
    x_slab = jnp.transpose(x_nchw, (1, 0, 2, 3)).reshape(C, N * HW)
    x_slab = jnp.pad(x_slab, ((0, cp - C), (0, 0)))

    nb = _pick_images_per_step(N, HW)
    lane_block = nb * HW
    grid = (N // nb,)

    kernel = functools.partial(_basic_block_kernel, H=H, W=W)
    out = pl.pallas_call(
        kernel,
        out_shape=jax.ShapeDtypeStruct((cp, N * HW), x_nchw.dtype),
        grid=grid,
        in_specs=[
            pl.BlockSpec((cp, lane_block), lambda b: (0, b)),
            pl.BlockSpec((cp, 9 * cp), lambda b: (0, 0)),
            pl.BlockSpec((cp, 1), lambda b: (0, 0)),
            pl.BlockSpec((cp, 9 * cp), lambda b: (0, 0)),
            pl.BlockSpec((cp, 1), lambda b: (0, 0)),
        ],
        out_specs=pl.BlockSpec((cp, lane_block), lambda b: (0, b)),
        scratch_shapes=[pltpu.VMEM((9 * cp, lane_block), compute_dtype)],
        compiler_params=pltpu.CompilerParams(
            dimension_semantics=("parallel",)),
    )(x_slab, w1_s, b1_c, w2_s, b2_c)

    return out[:C].reshape(C, N, H, W).transpose(1, 0, 2, 3)


# ----------------------------------------------------------------------------
# Pure-JAX reference (for correctness check)
# ----------------------------------------------------------------------------
def basic_block_ref(x_nchw, params):
    s1, b1 = _fold_bn(params["gamma1"], params["beta1"],
                      params["mean1"], params["var1"])
    s2, b2 = _fold_bn(params["gamma2"], params["beta2"],
                      params["mean2"], params["var2"])

    def conv(h, w):
        return jax.lax.conv_general_dilated(
            h, w, window_strides=(1, 1), padding="SAME",
            dimension_numbers=("NCHW", "HWIO", "NCHW"))

    h = jax.nn.relu(conv(x_nchw, params["w1"]) * s1[None, :, None, None]
                    + b1[None, :, None, None])
    h = conv(h, params["w2"]) * s2[None, :, None, None] + b2[None, :, None, None]
    return jax.nn.relu(x_nchw + h)


# ----------------------------------------------------------------------------
# Main
# ----------------------------------------------------------------------------
if __name__ == "__main__":
    # Small shapes consistent with the module: in_planes == out_planes (no
    # downsample), dimensionality = 2.  H*W = 256 is lane-aligned.
    N, C, H, W = 2, 4, 16, 16
    in_planes = out_planes = C

    key = jax.random.PRNGKey(0)
    k = jax.random.split(key, 8)

    params = {
        "w1": 0.1 * jax.random.normal(k[0], (3, 3, in_planes, out_planes),
                                      jnp.float32),
        "w2": 0.1 * jax.random.normal(k[1], (3, 3, out_planes, out_planes),
                                      jnp.float32),
        "gamma1": 1.0 + 0.1 * jax.random.normal(k[2], (out_planes,), jnp.float32),
        "beta1": 0.1 * jax.random.normal(k[3], (out_planes,), jnp.float32),
        "mean1": 0.1 * jax.random.normal(k[4], (out_planes,), jnp.float32),
        "var1": 1.0 + 0.1 * jax.random.uniform(k[5], (out_planes,), jnp.float32),
        "gamma2": 1.0 + 0.1 * jax.random.normal(k[6], (out_planes,), jnp.float32),
        "beta2": 0.1 * jax.random.normal(k[7], (out_planes,), jnp.float32),
        "mean2": jnp.zeros((out_planes,), jnp.float32),
        "var2": jnp.ones((out_planes,), jnp.float32),
    }

    x = jax.random.normal(jax.random.PRNGKey(1), (N, C, H, W), jnp.float32)

    y = jax.jit(basic_block_forward)(x, params)
    y = jax.block_until_ready(y)

    y_ref = jax.block_until_ready(basic_block_ref(x, params))
    assert y.shape == (N, C, H, W)
    # bf16 MXU operands with f32 accumulation vs. a pure-f32 reference:
    # bf16-appropriate tolerance (a wrong tap/shift would miss this by orders
    # of magnitude, so the check still guards real bugs).
    max_err = float(jnp.max(jnp.abs(y - y_ref)))
    assert jnp.allclose(y, y_ref, atol=5e-2, rtol=5e-2), max_err

    print("KERNEL_OK")
</pallas_src>

<mosaic_0001>
module attributes {stable_mosaic.version = 11 : i64} {
  func.func @_basic_block_kernel(%arg0: i32, %arg1: memref<16x512xf32, #tpu.memory_space<vmem>>, %arg2: memref<16x144xbf16, #tpu.memory_space<vmem>>, %arg3: memref<16x1xf32, #tpu.memory_space<vmem>>, %arg4: memref<16x144xbf16, #tpu.memory_space<vmem>>, %arg5: memref<16x1xf32, #tpu.memory_space<vmem>>, %arg6: memref<16x512xf32, #tpu.memory_space<vmem>>, %arg7: memref<144x512xbf16, #tpu.memory_space<vmem>>) attributes {dimension_semantics = [#tpu.dimension_semantics<parallel>], iteration_bounds = array<i64: 1>, scalar_prefetch = 0 : i64, scratch_operands = 1 : i64, tpu.core_type = #tpu.core_type<tc>, window_params = [{transform_indices = @transform_0, window_bounds = array<i64: 16, 512>}, {pipeline_mode = #tpu.pipeline_mode<synchronous>, transform_indices = @transform_1, window_bounds = array<i64: 16, 144>}, {pipeline_mode = #tpu.pipeline_mode<synchronous>, transform_indices = @transform_2, window_bounds = array<i64: 16, 1>}, {pipeline_mode = #tpu.pipeline_mode<synchronous>, transform_indices = @transform_3, window_bounds = array<i64: 16, 144>}, {pipeline_mode = #tpu.pipeline_mode<synchronous>, transform_indices = @transform_4, window_bounds = array<i64: 16, 1>}, {transform_indices = @transform_5, window_bounds = array<i64: 16, 512>}]} {
    %c0 = arith.constant 0 : index
    %c0_0 = arith.constant 0 : index
    %0 = vector.load %arg1[%c0, %c0_0] : memref<16x512xf32, #tpu.memory_space<vmem>>, vector<16x512xf32>
    %1 = tpu.iota {dimensions = array<i32: 1>} : vector<1x512xi32>
    %c255_i32 = arith.constant 255 : i32
    %2 = vector.broadcast %c255_i32 : i32 to vector<1x512xi32>
    %3 = arith.andi %1, %2 : vector<1x512xi32>
    %c15_i32 = arith.constant 15 : i32
    %4 = vector.broadcast %c15_i32 : i32 to vector<1x512xi32>
    %5 = arith.andi %3, %4 : vector<1x512xi32>
    %c16_i32 = arith.constant 16 : i32
    %6 = vector.broadcast %c16_i32 : i32 to vector<1x512xi32>
    %7 = arith.cmpi sge, %3, %6 : vector<1x512xi32>
    %c240_i32 = arith.constant 240 : i32
    %8 = vector.broadcast %c240_i32 : i32 to vector<1x512xi32>
    %9 = arith.cmpi slt, %3, %8 : vector<1x512xi32>
    %c1_i32 = arith.constant 1 : i32
    %10 = vector.broadcast %c1_i32 : i32 to vector<1x512xi32>
    %11 = arith.cmpi sge, %5, %10 : vector<1x512xi32>
    %c15_i32_1 = arith.constant 15 : i32
    %12 = vector.broadcast %c15_i32_1 : i32 to vector<1x512xi32>
    %13 = arith.cmpi slt, %5, %12 : vector<1x512xi32>
    %14 = arith.andi %7, %11 : vector<1x512xi1>
    %15 = arith.andi %7, %13 : vector<1x512xi1>
    %16 = arith.andi %9, %11 : vector<1x512xi1>
    %17 = arith.andi %9, %13 : vector<1x512xi1>
    %c17_i32 = arith.constant 17 : i32
    %18 = tpu.dynamic_rotate %0 by %c17_i32 dim 1 : vector<16x512xf32>, i32 -> vector<16x512xf32>
    %cst = arith.constant 0.000000e+00 : f32
    %19 = vector.shape_cast %14 : vector<1x512xi1> to vector<1x512xi1>
    %20 = vector.broadcast %19 : vector<1x512xi1> to vector<16x512xi1>
    %21 = vector.broadcast %cst : f32 to vector<16x512xf32>
    %22 = arith.select %20, %18, %21 : vector<16x512xi1>, vector<16x512xf32>
    %23 = arith.truncf %22 : vector<16x512xf32> to vector<16x512xbf16>
    %c0_2 = arith.constant 0 : index
    %c0_3 = arith.constant 0 : index
    %24 = vector.load %arg7[%c0_2, %c0_3] : memref<144x512xbf16, #tpu.memory_space<vmem>>, vector<16x512xbf16>
    tpu.vector_store %arg7[%c0_2, %c0_3], %23 {strides = array<i32>} : memref<144x512xbf16, #tpu.memory_space<vmem>>, vector<16x512xbf16>,
    %c16_i32_4 = arith.constant 16 : i32
    %25 = tpu.dynamic_rotate %0 by %c16_i32_4 dim 1 : vector<16x512xf32>, i32 -> vector<16x512xf32>
    %cst_5 = arith.constant 0.000000e+00 : f32
    %26 = vector.shape_cast %7 : vector<1x512xi1> to vector<1x512xi1>
    %27 = vector.broadcast %26 : vector<1x512xi1> to vector<16x512xi1>
    %28 = vector.broadcast %cst_5 : f32 to vector<16x512xf32>
    %29 = arith.select %27, %25, %28 : vector<16x512xi1>, vector<16x512xf32>
    %30 = arith.truncf %29 : vector<16x512xf32> to vector<16x512xbf16>
    %c16 = arith.constant 16 : index
    %c0_6 = arith.constant 0 : index
    %31 = vector.load %arg7[%c16, %c0_6] : memref<144x512xbf16, #tpu.memory_space<vmem>>, vector<16x512xbf16>
    tpu.vector_store %arg7[%c16, %c0_6], %30 {strides = array<i32>} : memref<144x512xbf16, #tpu.memory_space<vmem>>, vector<16x512xbf16>,
    %c15_i32_7 = arith.constant 15 : i32
    %32 = tpu.dynamic_rotate %0 by %c15_i32_7 dim 1 : vector<16x512xf32>, i32 -> vector<16x512xf32>
    %cst_8 = arith.constant 0.000000e+00 : f32
    %33 = vector.shape_cast %15 : vector<1x512xi1> to vector<1x512xi1>
    %34 = vector.broadcast %33 : vector<1x512xi1> to vector<16x512xi1>
    %35 = vector.broadcast %cst_8 : f32 to vector<16x512xf32>
    %36 = arith.select %34, %32, %35 : vector<16x512xi1>, vector<16x512xf32>
    %37 = arith.truncf %36 : vector<16x512xf32> to vector<16x512xbf16>
    %c32 = arith.constant 32 : index
    %c0_9 = arith.constant 0 : index
    %38 = vector.load %arg7[%c32, %c0_9] : memref<144x512xbf16, #tpu.memory_space<vmem>>, vector<16x512xbf16>
    tpu.vector_store %arg7[%c32, %c0_9], %37 {strides = array<i32>} : memref<144x512xbf16, #tpu.memory_space<vmem>>, vector<16x512xbf16>,
    %c1_i32_10 = arith.constant 1 : i32
    %39 = tpu.dynamic_rotate %0 by %c1_i32_10 dim 1 : vector<16x512xf32>, i32 -> vector<16x512xf32>
    %cst_11 = arith.constant 0.000000e+00 : f32
    %40 = vector.shape_cast %11 : vector<1x512xi1> to vector<1x512xi1>
    %41 = vector.broadcast %40 : vector<1x512xi1> to vector<16x512xi1>
    %42 = vector.broadcast %cst_11 : f32 to vector<16x512xf32>
    %43 = arith.select %41, %39, %42 : vector<16x512xi1>, vector<16x512xf32>
    %44 = arith.truncf %43 : vector<16x512xf32> to vector<16x512xbf16>
    %c48 = arith.constant 48 : index
    %c0_12 = arith.constant 0 : index
    %45 = vector.load %arg7[%c48, %c0_12] : memref<144x512xbf16, #tpu.memory_space<vmem>>, vector<16x512xbf16>
    tpu.vector_store %arg7[%c48, %c0_12], %44 {strides = array<i32>} : memref<144x512xbf16, #tpu.memory_space<vmem>>, vector<16x512xbf16>,
    %46 = arith.truncf %0 : vector<16x512xf32> to vector<16x512xbf16>
    %c64 = arith.constant 64 : index
    %c0_13 = arith.constant 0 : index
    %47 = vector.load %arg7[%c64, %c0_13] : memref<144x512xbf16, #tpu.memory_space<vmem>>, vector<16x512xbf16>
    tpu.vector_store %arg7[%c64, %c0_13], %46 {strides = array<i32>} : memref<144x512xbf16, #tpu.memory_space<vmem>>, vector<16x512xbf16>,
    %c511_i32 = arith.constant 511 : i32
    %48 = tpu.dynamic_rotate %0 by %c511_i32 dim 1 : vector<16x512xf32>, i32 -> vector<16x512xf32>
    %cst_14 = arith.constant 0.000000e+00 : f32
    %49 = vector.shape_cast %13 : vector<1x512xi1> to vector<1x512xi1>
    %50 = vector.broadcast %49 : vector<1x512xi1> to vector<16x512xi1>
    %51 = vector.broadcast %cst_14 : f32 to vector<16x512xf32>
    %52 = arith.select %50, %48, %51 : vector<16x512xi1>, vector<16x512xf32>
    %53 = arith.truncf %52 : vector<16x512xf32> to vector<16x512xbf16>
    %c80 = arith.constant 80 : index
    %c0_15 = arith.constant 0 : index
    %54 = vector.load %arg7[%c80, %c0_15] : memref<144x512xbf16, #tpu.memory_space<vmem>>, vector<16x512xbf16>
    tpu.vector_store %arg7[%c80, %c0_15], %53 {strides = array<i32>} : memref<144x512xbf16, #tpu.memory_space<vmem>>, vector<16x512xbf16>,
    %c497_i32 = arith.constant 497 : i32
    %55 = tpu.dynamic_rotate %0 by %c497_i32 dim 1 : vector<16x512xf32>, i32 -> vector<16x512xf32>
    %cst_16 = arith.constant 0.000000e+00 : f32
    %56 = vector.shape_cast %16 : vector<1x512xi1> to vector<1x512xi1>
    %57 = vector.broadcast %56 : vector<1x512xi1> to vector<16x512xi1>
    %58 = vector.broadcast %cst_16 : f32 to vector<16x512xf32>
    %59 = arith.select %57, %55, %58 : vector<16x512xi1>, vector<16x512xf32>
    %60 = arith.truncf %59 : vector<16x512xf32> to vector<16x512xbf16>
    %c96 = arith.constant 96 : index
    %c0_17 = arith.constant 0 : index
    %61 = vector.load %arg7[%c96, %c0_17] : memref<144x512xbf16, #tpu.memory_space<vmem>>, vector<16x512xbf16>
    tpu.vector_store %arg7[%c96, %c0_17], %60 {strides = array<i32>} : memref<144x512xbf16, #tpu.memory_space<vmem>>, vector<16x512xbf16>,
    %c496_i32 = arith.constant 496 : i32
    %62 = tpu.dynamic_rotate %0 by %c496_i32 dim 1 : vector<16x512xf32>, i32 -> vector<16x512xf32>
    %cst_18 = arith.constant 0.000000e+00 : f32
    %63 = vector.shape_cast %9 : vector<1x512xi1> to vector<1x512xi1>
    %64 = vector.broadcast %63 : vector<1x512xi1> to vector<16x512xi1>
    %65 = vector.broadcast %cst_18 : f32 to vector<16x512xf32>
    %66 = arith.select %64, %62, %65 : vector<16x512xi1>, vector<16x512xf32>
    %67 = arith.truncf %66 : vector<16x512xf32> to vector<16x512xbf16>
    %c112 = arith.constant 112 : index
    %c0_19 = arith.constant 0 : index
    %68 = vector.load %arg7[%c112, %c0_19] : memref<144x512xbf16, #tpu.memory_space<vmem>>, vector<16x512xbf16>
    tpu.vector_store %arg7[%c112, %c0_19], %67 {strides = array<i32>} : memref<144x512xbf16, #tpu.memory_space<vmem>>, vector<16x512xbf16>,
    %c495_i32 = arith.constant 495 : i32
    %69 = tpu.dynamic_rotate %0 by %c495_i32 dim 1 : vector<16x512xf32>, i32 -> vector<16x512xf32>
    %cst_20 = arith.constant 0.000000e+00 : f32
    %70 = vector.shape_cast %17 : vector<1x512xi1> to vector<1x512xi1>
    %71 = vector.broadcast %70 : vector<1x512xi1> to vector<16x512xi1>
    %72 = vector.broadcast %cst_20 : f32 to vector<16x512xf32>
    %73 = arith.select %71, %69, %72 : vector<16x512xi1>, vector<16x512xf32>
    %74 = arith.truncf %73 : vector<16x512xf32> to vector<16x512xbf16>
    %c128 = arith.constant 128 : index
    %c0_21 = arith.constant 0 : index
    %75 = vector.load %arg7[%c128, %c0_21] : memref<144x512xbf16, #tpu.memory_space<vmem>>, vector<16x512xbf16>
    tpu.vector_store %arg7[%c128, %c0_21], %74 {strides = array<i32>} : memref<144x512xbf16, #tpu.memory_space<vmem>>, vector<16x512xbf16>,
    %c0_22 = arith.constant 0 : index
    %c0_23 = arith.constant 0 : index
    %76 = vector.load %arg2[%c0_22, %c0_23] : memref<16x144xbf16, #tpu.memory_space<vmem>>, vector<16x144xbf16>
    %c0_24 = arith.constant 0 : index
    %c0_25 = arith.constant 0 : index
    %77 = vector.load %arg7[%c0_24, %c0_25] : memref<144x512xbf16, #tpu.memory_space<vmem>>, vector<144x512xbf16>
    %cst_26 = arith.constant dense<0.000000e+00> : vector<16x512xf32>
    %78 = tpu.matmul %76, %77, %cst_26 {dimension_numbers = #tpu.dot_dimension_numbers<[1], [0], [0], [1], [0, 0, 1, 1], [], []>} : vector<16x144xbf16>, vector<144x512xbf16>, vector<16x512xf32> -> vector<16x512xf32>
    %c0_27 = arith.constant 0 : index
    %c0_28 = arith.constant 0 : index
    %79 = vector.load %arg3[%c0_27, %c0_28] : memref<16x1xf32, #tpu.memory_space<vmem>>, vector<16x1xf32>
    %80 = vector.broadcast %79 : vector<16x1xf32> to vector<16x512xf32>
    %81 = arith.addf %78, %80 : vector<16x512xf32>
    %cst_29 = arith.constant 0.000000e+00 : f32
    %82 = vector.broadcast %cst_29 : f32 to vector<16x512xf32>
    %83 = arith.maximumf %81, %82 : vector<16x512xf32>
    %c17_i32_30 = arith.constant 17 : i32
    %84 = tpu.dynamic_rotate %83 by %c17_i32_30 dim 1 : vector<16x512xf32>, i32 -> vector<16x512xf32>
    %cst_31 = arith.constant 0.000000e+00 : f32
    %85 = vector.shape_cast %14 : vector<1x512xi1> to vector<1x512xi1>
    %86 = vector.broadcast %85 : vector<1x512xi1> to vector<16x512xi1>
    %87 = vector.broadcast %cst_31 : f32 to vector<16x512xf32>
    %88 = arith.select %86, %84, %87 : vector<16x512xi1>, vector<16x512xf32>
    %89 = arith.truncf %88 : vector<16x512xf32> to vector<16x512xbf16>
    %c0_32 = arith.constant 0 : index
    %c0_33 = arith.constant 0 : index
    %90 = vector.load %arg7[%c0_32, %c0_33] : memref<144x512xbf16, #tpu.memory_space<vmem>>, vector<16x512xbf16>
    tpu.vector_store %arg7[%c0_32, %c0_33], %89 {strides = array<i32>} : memref<144x512xbf16, #tpu.memory_space<vmem>>, vector<16x512xbf16>,
    %c16_i32_34 = arith.constant 16 : i32
    %91 = tpu.dynamic_rotate %83 by %c16_i32_34 dim 1 : vector<16x512xf32>, i32 -> vector<16x512xf32>
    %cst_35 = arith.constant 0.000000e+00 : f32
    %92 = vector.shape_cast %7 : vector<1x512xi1> to vector<1x512xi1>
    %93 = vector.broadcast %92 : vector<1x512xi1> to vector<16x512xi1>
    %94 = vector.broadcast %cst_35 : f32 to vector<16x512xf32>
    %95 = arith.select %93, %91, %94 : vector<16x512xi1>, vector<16x512xf32>
    %96 = arith.truncf %95 : vector<16x512xf32> to vector<16x512xbf16>
    %c16_36 = arith.constant 16 : index
    %c0_37 = arith.constant 0 : index
    %97 = vector.load %arg7[%c16_36, %c0_37] : memref<144x512xbf16, #tpu.memory_space<vmem>>, vector<16x512xbf16>
    tpu.vector_store %arg7[%c16_36, %c0_37], %96 {strides = array<i32>} : memref<144x512xbf16, #tpu.memory_space<vmem>>, vector<16x512xbf16>,
    %c15_i32_38 = arith.constant 15 : i32
    %98 = tpu.dynamic_rotate %83 by %c15_i32_38 dim 1 : vector<16x512xf32>, i32 -> vector<16x512xf32>
    %cst_39 = arith.constant 0.000000e+00 : f32
    %99 = vector.shape_cast %15 : vector<1x512xi1> to vector<1x512xi1>
    %100 = vector.broadcast %99 : vector<1x512xi1> to vector<16x512xi1>
    %101 = vector.broadcast %cst_39 : f32 to vector<16x512xf32>
    %102 = arith.select %100, %98, %101 : vector<16x512xi1>, vector<16x512xf32>
    %103 = arith.truncf %102 : vector<16x512xf32> to vector<16x512xbf16>
    %c32_40 = arith.constant 32 : index
    %c0_41 = arith.constant 0 : index
    %104 = vector.load %arg7[%c32_40, %c0_41] : memref<144x512xbf16, #tpu.memory_space<vmem>>, vector<16x512xbf16>
    tpu.vector_store %arg7[%c32_40, %c0_41], %103 {strides = array<i32>} : memref<144x512xbf16, #tpu.memory_space<vmem>>, vector<16x512xbf16>,
    %c1_i32_42 = arith.constant 1 : i32
    %105 = tpu.dynamic_rotate %83 by %c1_i32_42 dim 1 : vector<16x512xf32>, i32 -> vector<16x512xf32>
    %cst_43 = arith.constant 0.000000e+00 : f32
    %106 = vector.shape_cast %11 : vector<1x512xi1> to vector<1x512xi1>
    %107 = vector.broadcast %106 : vector<1x512xi1> to vector<16x512xi1>
    %108 = vector.broadcast %cst_43 : f32 to vector<16x512xf32>
    %109 = arith.select %107, %105, %108 : vector<16x512xi1>, vector<16x512xf32>
    %110 = arith.truncf %109 : vector<16x512xf32> to vector<16x512xbf16>
    %c48_44 = arith.constant 48 : index
    %c0_45 = arith.constant 0 : index
    %111 = vector.load %arg7[%c48_44, %c0_45] : memref<144x512xbf16, #tpu.memory_space<vmem>>, vector<16x512xbf16>
    tpu.vector_store %arg7[%c48_44, %c0_45], %110 {strides = array<i32>} : memref<144x512xbf16, #tpu.memory_space<vmem>>, vector<16x512xbf16>,
    %112 = arith.truncf %83 : vector<16x512xf32> to vector<16x512xbf16>
    %c64_46 = arith.constant 64 : index
    %c0_47 = arith.constant 0 : index
    %113 = vector.load %arg7[%c64_46, %c0_47] : memref<144x512xbf16, #tpu.memory_space<vmem>>, vector<16x512xbf16>
    tpu.vector_store %arg7[%c64_46, %c0_47], %112 {strides = array<i32>} : memref<144x512xbf16, #tpu.memory_space<vmem>>, vector<16x512xbf16>,
    %c511_i32_48 = arith.constant 511 : i32
    %114 = tpu.dynamic_rotate %83 by %c511_i32_48 dim 1 : vector<16x512xf32>, i32 -> vector<16x512xf32>
    %cst_49 = arith.constant 0.000000e+00 : f32
    %115 = vector.shape_cast %13 : vector<1x512xi1> to vector<1x512xi1>
    %116 = vector.broadcast %115 : vector<1x512xi1> to vector<16x512xi1>
    %117 = vector.broadcast %cst_49 : f32 to vector<16x512xf32>
    %118 = arith.select %116, %114, %117 : vector<16x512xi1>, vector<16x512xf32>
    %119 = arith.truncf %118 : vector<16x512xf32> to vector<16x512xbf16>
    %c80_50 = arith.constant 80 : index
    %c0_51 = arith.constant 0 : index
    %120 = vector.load %arg7[%c80_50, %c0_51] : memref<144x512xbf16, #tpu.memory_space<vmem>>, vector<16x512xbf16>
    tpu.vector_store %arg7[%c80_50, %c0_51], %119 {strides = array<i32>} : memref<144x512xbf16, #tpu.memory_space<vmem>>, vector<16x512xbf16>,
    %c497_i32_52 = arith.constant 497 : i32
    %121 = tpu.dynamic_rotate %83 by %c497_i32_52 dim 1 : vector<16x512xf32>, i32 -> vector<16x512xf32>
    %cst_53 = arith.constant 0.000000e+00 : f32
    %122 = vector.shape_cast %16 : vector<1x512xi1> to vector<1x512xi1>
    %123 = vector.broadcast %122 : vector<1x512xi1> to vector<16x512xi1>
    %124 = vector.broadcast %cst_53 : f32 to vector<16x512xf32>
    %125 = arith.select %123, %121, %124 : vector<16x512xi1>, vector<16x512xf32>
    %126 = arith.truncf %125 : vector<16x512xf32> to vector<16x512xbf16>
    %c96_54 = arith.constant 96 : index
    %c0_55 = arith.constant 0 : index
    %127 = vector.load %arg7[%c96_54, %c0_55] : memref<144x512xbf16, #tpu.memory_space<vmem>>, vector<16x512xbf16>
    tpu.vector_store %arg7[%c96_54, %c0_55], %126 {strides = array<i32>} : memref<144x512xbf16, #tpu.memory_space<vmem>>, vector<16x512xbf16>,
    %c496_i32_56 = arith.constant 496 : i32
    %128 = tpu.dynamic_rotate %83 by %c496_i32_56 dim 1 : vector<16x512xf32>, i32 -> vector<16x512xf32>
    %cst_57 = arith.constant 0.000000e+00 : f32
    %129 = vector.shape_cast %9 : vector<1x512xi1> to vector<1x512xi1>
    %130 = vector.broadcast %129 : vector<1x512xi1> to vector<16x512xi1>
    %131 = vector.broadcast %cst_57 : f32 to vector<16x512xf32>
    %132 = arith.select %130, %128, %131 : vector<16x512xi1>, vector<16x512xf32>
    %133 = arith.truncf %132 : vector<16x512xf32> to vector<16x512xbf16>
    %c112_58 = arith.constant 112 : index
    %c0_59 = arith.constant 0 : index
    %134 = vector.load %arg7[%c112_58, %c0_59] : memref<144x512xbf16, #tpu.memory_space<vmem>>, vector<16x512xbf16>
    tpu.vector_store %arg7[%c112_58, %c0_59], %133 {strides = array<i32>} : memref<144x512xbf16, #tpu.memory_space<vmem>>, vector<16x512xbf16>,
    %c495_i32_60 = arith.constant 495 : i32
    %135 = tpu.dynamic_rotate %83 by %c495_i32_60 dim 1 : vector<16x512xf32>, i32 -> vector<16x512xf32>
    %cst_61 = arith.constant 0.000000e+00 : f32
    %136 = vector.shape_cast %17 : vector<1x512xi1> to vector<1x512xi1>
    %137 = vector.broadcast %136 : vector<1x512xi1> to vector<16x512xi1>
    %138 = vector.broadcast %cst_61 : f32 to vector<16x512xf32>
    %139 = arith.select %137, %135, %138 : vector<16x512xi1>, vector<16x512xf32>
    %140 = arith.truncf %139 : vector<16x512xf32> to vector<16x512xbf16>
    %c128_62 = arith.constant 128 : index
    %c0_63 = arith.constant 0 : index
    %141 = vector.load %arg7[%c128_62, %c0_63] : memref<144x512xbf16, #tpu.memory_space<vmem>>, vector<16x512xbf16>
    tpu.vector_store %arg7[%c128_62, %c0_63], %140 {strides = array<i32>} : memref<144x512xbf16, #tpu.memory_space<vmem>>, vector<16x512xbf16>,
    %c0_64 = arith.constant 0 : index
    %c0_65 = arith.constant 0 : index
    %142 = vector.load %arg4[%c0_64, %c0_65] : memref<16x144xbf16, #tpu.memory_space<vmem>>, vector<16x144xbf16>
    %c0_66 = arith.constant 0 : index
    %c0_67 = arith.constant 0 : index
    %143 = vector.load %arg7[%c0_66, %c0_67] : memref<144x512xbf16, #tpu.memory_space<vmem>>, vector<144x512xbf16>
    %cst_68 = arith.constant dense<0.000000e+00> : vector<16x512xf32>
    %144 = tpu.matmul %142, %143, %cst_68 {dimension_numbers = #tpu.dot_dimension_numbers<[1], [0], [0], [1], [0, 0, 1, 1], [], []>} : vector<16x144xbf16>, vector<144x512xbf16>, vector<16x512xf32> -> vector<16x512xf32>
    %c0_69 = arith.constant 0 : index
    %c0_70 = arith.constant 0 : index
    %145 = vector.load %arg5[%c0_69, %c0_70] : memref<16x1xf32, #tpu.memory_space<vmem>>, vector<16x1xf32>
    %146 = vector.broadcast %145 : vector<16x1xf32> to vector<16x512xf32>
    %147 = arith.addf %144, %146 : vector<16x512xf32>
    %148 = arith.addf %0, %147 : vector<16x512xf32>
    %cst_71 = arith.constant 0.000000e+00 : f32
    %149 = vector.broadcast %cst_71 : f32 to vector<16x512xf32>
    %150 = arith.maximumf %148, %149 : vector<16x512xf32>
    %c0_72 = arith.constant 0 : index
    %c0_73 = arith.constant 0 : index
    %151 = vector.load %arg6[%c0_72, %c0_73] : memref<16x512xf32, #tpu.memory_space<vmem>>, vector<16x512xf32>
    tpu.vector_store %arg6[%c0_72, %c0_73], %150 {strides = array<i32>} : memref<16x512xf32, #tpu.memory_space<vmem>>, vector<16x512xf32>,
    return
  }
  func.func @transform_0(%arg0: i32) -> (i32, i32) {
    %c0_i32 = arith.constant 0 : i32
    %c0_i32_0 = arith.constant 0 : i32
    return %c0_i32, %arg0 : i32, i32
  }
  func.func @transform_1(%arg0: i32) -> (i32, i32) {
    %c0_i32 = arith.constant 0 : i32
    %c0_i32_0 = arith.constant 0 : i32
    %c0_i32_1 = arith.constant 0 : i32
    return %c0_i32, %c0_i32_0 : i32, i32
  }
  func.func @transform_2(%arg0: i32) -> (i32, i32) {
    %c0_i32 = arith.constant 0 : i32
    %c0_i32_0 = arith.constant 0 : i32
    %c0_i32_1 = arith.constant 0 : i32
    return %c0_i32, %c0_i32_0 : i32, i32
  }
  func.func @transform_3(%arg0: i32) -> (i32, i32) {
    %c0_i32 = arith.constant 0 : i32
    %c0_i32_0 = arith.constant 0 : i32
    %c0_i32_1 = arith.constant 0 : i32
    return %c0_i32, %c0_i32_0 : i32, i32
  }
  func.func @transform_4(%arg0: i32) -> (i32, i32) {
    %c0_i32 = arith.constant 0 : i32
    %c0_i32_0 = arith.constant 0 : i32
    %c0_i32_1 = arith.constant 0 : i32
    return %c0_i32, %c0_i32_0 : i32, i32
  }
  func.func @transform_5(%arg0: i32) -> (i32, i32) {
    %c0_i32 = arith.constant 0 : i32
    %c0_i32_0 = arith.constant 0 : i32
    return %c0_i32, %arg0 : i32, i32
  }
}

</mosaic_0001>

<bundles_post_ra>
// kernel: basic_block_forward.1
= control target key start
LH: loop header
LB: loop body
LE: loop exit
PB: predicated region body
PF: predicated region fallthrough
CT: control target
= control target key end

     0   :  { %s1656_s9 = smov 17   ;;  %s1657_s10 = smov 16   ;;  %vm2568_vm0 = vcmask 130048   ;;  %v1664_v13 = vmov 0   ;;  %v29_v16 = vlaneseq  ;;  %v2618_v31 = vmov 0  ;;  %s2559_s0 = inlined_call_operand.vmem [shape: f32[16,512], index: 0, kind: input, shape index: {}]   ;;  %s2560_s1 = inlined_call_operand.vmem [shape: bf16[16,144], index: 1, kind: input, shape index: {}]   ;;  %s2561_s2 = inlined_call_operand.vmem [shape: f32[16,1], index: 2, kind: input, shape index: {}]   ;;  %s2562_s3 = inlined_call_operand.vmem [shape: bf16[16,144], index: 3, kind: input, shape index: {}]   ;;  %s2563_s4 = inlined_call_operand.vmem [shape: f32[16,1], index: 4, kind: input, shape index: {}]   ;;  %s2564_s5 = inlined_call_operand.vmem [shape: f32[16,512], index: 5, kind: output, shape index: {}]  }
   0x1   :  { %v1698_v0 = vld [vmem:[%s2559_s0 + $0x10] sm:$0xff]  ;;  %v1708_v2 = vld [vmem:[%s2559_s0] sm:$0xff]  ;;  %v1720_v5 = vld [vmem:[%s2559_s0 + $0x18] sm:$0xff]  ;;  %s1658_s11 = smov 15   ;;  %s1659_s12 = smov 1   ;;  %1480 = vset.pattern.permute.xlu0 %v1664_v13  ;;  %1481 = vset.pattern.permute.xlu1 %v1664_v13  ;;  %v2620_v35 = vmov 0 }
   0x2   :  { %v1703_v1 = vld [vmem:[%s2559_s0 + $0x30] sm:$0xff]  ;;  %v1715_v4 = vld [vmem:[%s2559_s0 + $0x20] sm:$0xff]  ;;  %v1725_v6 = vld [vmem:[%s2559_s0 + $0x38] sm:$0xff]  ;;  %s1660_s13 = smov 127   ;;  %s1661_s14 = smov 113   ;;  %v1786_v17 = vand.u32 127, %v29_v16 }
   0x3   :  { %v1330_v3 = vpack.i.bf16 %v1703_v1, %v1698_v0  ;;  %v1320_v7 = vpack.i.bf16 %v1715_v4, %v1708_v2  ;;  %v1732_v8 = vld [vmem:[%s2559_s0 + $0x8] sm:$0xff]  ;;  %v1335_v10 = vpack.i.bf16 %v1725_v6, %v1720_v5  ;;  %s1662_s15 = smov 112   ;;  %s1663_s16 = smov 111   ;;  %v512_v15 = vld [vmem:[%s2561_s2] sm:$0xff]  ;;  %v2622_v41 = vmov 0 }
   0x4   :  { %v1737_v9 = vld [vmem:[%s2559_s0 + $0x28] sm:$0xff]  ;;  %v1789_v18 = vadd.s32 384, %v1786_v17  ;;  %v1792_v19 = vadd.s32 128, %v1786_v17  ;;  %v32_v20 = vadd.s32 256, %v1786_v17  ;;  %v34_v21 = vand.u32 255, %v1786_v17 }
   0x5   :  { %1331 = vrot.lane.b32.xlu1 %v1330_v3, %s1656_s9  ;;  %1321 = vrot.lane.b32.xlu0 %v1320_v7, %s1656_s9  ;;  %v1325_v11 = vpack.i.bf16 %v1737_v9, %v1732_v8  ;;  %v1644_v12 = vld [vmem:[%s2560_s1 + $0x4] ss:$8 sps:$4 sm:$0xff]   ;;  %vm2567_vm5 = vcmp.lt.s32.totalorder %v1786_v17, 17  ;;  %v2624_v44 = vmov 0  ;;  %vm2570_vm10 = vcmp.lt.s32.totalorder %v1786_v17, 16 }
   0x6   :  { %1137 = vmatprep.mubr.msk.bf16.mxu0 %vm2568_vm0, %v1644_v12  ;;  %1138 = vmatprep.mubr.msk.bf16.mxu1 %vm2568_vm0, %v1644_v12  ;;  %v513_v14 = vld [vmem:[%s2561_s2 + $0x8] sm:$0xff]  ;;  %v37_v22 = vand.u32 255, %v1789_v18  ;;  %v35_v23 = vand.u32 255, %v1792_v19  ;;  %v36_v24 = vand.u32 255, %v32_v20  ;;  %v1798_v25 = vand.u32 15, %v34_v21 }
   0x7   :  { %vm1810_vm1 = vcmp.ge.s32.totalorder %v34_v21, 16  ;;  %v2626_v49 = vmov 0  ;;  %vm2581_vm15 = vcmp.lt.s32.totalorder %v1786_v17, 15  ;;  %v2651_v18 = vmov 0 }
   0x8   :  { %v1802_v26 = vand.u32 15, %v37_v22  ;;  %v1806_v28 = vand.u32 15, %v35_v23  ;;  %v1808_v29 = vand.u32 15, %v36_v24  ;;  %v2619_v31 = vsel %vm1810_vm1, 4294967295, %v2618_v31 }
   0x9   :  { %1336 = vrot.lane.b32.xlu1 %v1335_v10, %s1656_s9  ;;  %1326 = vrot.lane.b32.xlu0 %v1325_v11, %s1656_s9  ;;  %vm50_vm2 = vcmp.ge.s32.totalorder %v1798_v25, 1  ;;  %vm1818_vm6 = vcmp.ge.s32.totalorder %v36_v24, 16 }
   0xa   :  { %vm2573_vm3 = vcmp.ge.s32.totalorder %v1802_v26, 1  ;;  %vm2569_vm4 = vcmp.ge.s32.totalorder %v1806_v28, 1  ;;  %v2621_v35 = vsel %vm1818_vm6, 4294967295, %v2620_v35  ;;  %vm2577_vm7 = vcmp.ge.s32.totalorder %v1808_v29, 1  ;;  %vm1827_vm8 = vmand %vm1810_vm1, %vm50_vm2 }
   0xb   :  { %v2623_v41 = vsel %vm1827_vm8, 4294967295, %v2622_v41  ;;  %vm1834_vm9 = vmpackc.low %vm2573_vm3, %vm2573_vm3 }
   0xc   :  { %v2625_v44 = vsel %vm1834_vm9, 4294967295, %v2624_v44  ;;  %vm1851_vm11 = vmand %vm1818_vm6, %vm2577_vm7 }
   0xd   :  { %1346 = vrot.lane.b32.xlu1 %v1325_v11, %s1657_s10  ;;  %1341 = vrot.lane.b32.xlu0 %v1320_v7, %s1657_s10  ;;  %v2627_v49 = vsel %vm1851_vm11, 4294967295, %v2626_v49  ;;  %vm1862_vm12 = vmpackc.low %vm2569_vm4, %vm2569_vm4 }
   0xe   :  { %vm2565_vm13 = vmpackc.low %vm1827_vm8, %vm1827_vm8 }
   0xf   :  { %vm2566_vm14 = vmpackc.low %vm1851_vm11, %vm1851_vm11 }
  0x10   :  { %vm2574_vm0 = vmpackc.low %vm1818_vm6, %vm1818_vm6 }
  0x11   :  { %1356 = vrot.lane.b32.xlu1 %v1335_v10, %s1657_s10  ;;  %1351 = vrot.lane.b32.xlu0 %v1330_v3, %s1657_s10 }
  0x15   :  { %1366 = vrot.lane.b32.xlu1 %v1325_v11, %s1658_s11  ;;  %1361 = vrot.lane.b32.xlu0 %v1320_v7, %s1658_s11 }
  0x19   :  { %1376 = vrot.lane.b32.xlu1 %v1335_v10, %s1658_s11  ;;  %1371 = vrot.lane.b32.xlu0 %v1330_v3, %s1658_s11 }
  0x1d   :  { %1386 = vrot.lane.b32.xlu1 %v1325_v11, %s1659_s12  ;;  %1381 = vrot.lane.b32.xlu0 %v1320_v7, %s1659_s12 }
  0x21   :  { %1396 = vrot.lane.b32.xlu1 %v1335_v10, %s1659_s12  ;;  %1391 = vrot.lane.b32.xlu0 %v1330_v3, %s1659_s12 }
  0x25   :  { %1406 = vrot.lane.b32.xlu1 %v1325_v11, %s1660_s13  ;;  %1401 = vrot.lane.b32.xlu0 %v1320_v7, %s1660_s13 }
  0x29   :  { %1416 = vrot.lane.b32.xlu1 %v1335_v10, %s1660_s13  ;;  %1411 = vrot.lane.b32.xlu0 %v1330_v3, %s1660_s13 }
  0x2d   :  { %1426 = vrot.lane.b32.xlu1 %v1325_v11, %s1661_s14  ;;  %1421 = vrot.lane.b32.xlu0 %v1320_v7, %s1661_s14 }
  0x31   :  { %1436 = vrot.lane.b32.xlu1 %v1335_v10, %s1661_s14  ;;  %1431 = vrot.lane.b32.xlu0 %v1330_v3, %s1661_s14 }
  0x35   :  { %1446 = vrot.lane.b32.xlu1 %v1325_v11, %s1662_s15  ;;  %1441 = vrot.lane.b32.xlu0 %v1320_v7, %s1662_s15 }
  0x39   :  { %1456 = vrot.lane.b32.xlu1 %v1335_v10, %s1662_s15  ;;  %1451 = vrot.lane.b32.xlu0 %v1330_v3, %s1662_s15 }
  0x3d   :  { %1466 = vrot.lane.b32.xlu1 %v1325_v11, %s1663_s16  ;;  %1461 = vrot.lane.b32.xlu0 %v1320_v7, %s1663_s16 }
  0x41   :  { %1476 = vrot.lane.b32.xlu1 %v1335_v10, %s1663_s16  ;;  %1471 = vrot.lane.b32.xlu0 %v1330_v3, %s1663_s16 }
  0x45   :  { %521 = vperm.xlu1 %1481, %v513_v14   ;;  %516 = vperm.xlu0 %1480, %v512_v15  }
  0x77   :  { %v1332_v27 = vpop.permute.xlu1 %1331  ;;  %v1322_v30 = vpop.permute.xlu0 %1321 }
  0x78   :  { %v1334_v32 = vunpack.i.h.bf16 %v1332_v27  ;;  %v1333_v33 = vunpack.i.l.bf16 %v1332_v27  ;;  %v1324_v36 = vunpack.i.h.bf16 %v1322_v30  ;;  %v1323_v37 = vunpack.i.l.bf16 %v1322_v30 }
  0x7b   :  { %v1337_v34 = vpop.permute.xlu1 %1336  ;;  %v1327_v40 = vpop.permute.xlu0 %1326 }
  0x7c   :  { %v1339_v38 = vunpack.i.h.bf16 %v1337_v34  ;;  %v1338_v39 = vunpack.i.l.bf16 %v1337_v34  ;;  %v1329_v42 = vunpack.i.h.bf16 %v1327_v40  ;;  %v1328_v43 = vunpack.i.l.bf16 %v1327_v40 }
  0x7e   :  { %v91_v45 = vsel %vm2567_vm5, %v1333_v33, %v1338_v39  ;;  %v92_v46 = vsel %vm2567_vm5, %v1334_v32, %v1339_v38  ;;  %v97_v47 = vsel %vm2567_vm5, %v1338_v39, %v1323_v37  ;;  %v98_v48 = vsel %vm2567_vm5, %v1339_v38, %v1324_v36 }
  0x7f   :  { %v1347_v50 = vpop.permute.xlu1 %1346  ;;  %v95_v51 = vsel %vm2567_vm5, %v1323_v37, %v1328_v43  ;;  %v96_v52 = vsel %vm2567_vm5, %v1324_v36, %v1329_v42  ;;  %v1186_v54 = vpack.c.bf16 %v92_v46, %v91_v45  ;;  %v1147_v55 = vpack.c.bf16 %v98_v48, %v97_v47  ;;  %v1342_v58 = vpop.permute.xlu0 %1341 }
  0x80   :  { %v1349_v56 = vunpack.i.h.bf16 %v1347_v50  ;;  %v1348_v57 = vunpack.i.l.bf16 %v1347_v50  ;;  %v1144_v59 = vpack.c.bf16 %v96_v52, %v95_v51  ;;  %v93_v60 = vsel %vm2567_vm5, %v1328_v43, %v1333_v33 }
  0x81   :  { %v1344_v61 = vunpack.i.h.bf16 %v1342_v58  ;;  %v1343_v62 = vunpack.i.l.bf16 %v1342_v58  ;;  %1187 = vmatprep.subr.msk.bf16.mxu1 %vm1834_vm9, %v1186_v54  ;;  %v94_v63 = vsel %vm2567_vm5, %v1329_v42, %v1334_v32  ;;  %vm2575_vm5 = vcmp.lt.s32.totalorder %v1798_v25, 15 }
  0x82   :  { %1145 = vmatprep.subr.msk.bf16.mxu0 %vm1862_vm12, %v1144_v59  ;;  %v1189_v3 = vpack.c.bf16 %v94_v63, %v93_v60  ;;  %v2630_v46 = vmov 0  ;;  %v2632_v51 = vmov 0  ;;  %v2634_v59 = vmov 0 }
  0x83   :  { %1148 = vmatpush1.bf16.msk.msra.mxu0 %vm2565_vm13, %v1147_v55  ;;  %v1357_v7 = vpop.permute.xlu1 %1356  ;;  %v144_v10 = vsel %vm2570_vm10, %v1343_v62, %v1348_v57  ;;  %v145_v11 = vsel %vm2570_vm10, %v1344_v61, %v1349_v56  ;;  %v1352_v14 = vpop.permute.xlu0 %1351  ;;  %vm2571_vm13 = vmpackc.low %vm1810_vm1, %vm1810_vm1 }
  0x84   :  { %1190 = vmatpush1.bf16.msk.msra.mxu1 %vm2566_vm14, %v1189_v3  ;;  %v1359_v12 = vunpack.i.h.bf16 %v1357_v7  ;;  %v1358_v13 = vunpack.i.l.bf16 %v1357_v7  ;;  %v165_v15 = vpack.c.bf16 %v145_v11, %v144_v10  ;;  %v1354_v16 = vunpack.i.h.bf16 %v1352_v14 }
  0x85   :  { %v1353_v20 = vunpack.i.l.bf16 %v1352_v14  ;;  %vm2572_vm14 = vcmp.lt.s32.totalorder %v1806_v28, 15  ;;  %v2636_v11 = vmov 0 }
  0x86   :  { %v146_v21 = vsel %vm2570_vm10, %v1358_v13, %v1343_v62  ;;  %v147_v24 = vsel %vm2570_vm10, %v1359_v12, %v1344_v61  ;;  %539 = vmatprep.subr.bf16.mxu0 %v165_v15  ;;  %v143_v30 = vsel %vm2570_vm10, %v1349_v56, %v1354_v16  ;;  %v141_v40 = vsel %vm2570_vm10, %v1354_v16, %v1359_v12  ;;  %vm1923_vm4 = vmpackc.low %vm2572_vm14, %vm2572_vm14 }
  0x87   :  { %v1150_v27 = vpack.c.bf16 %v147_v24, %v146_v21  ;;  %v142_v32 = vsel %vm2570_vm10, %v1348_v57, %v1353_v20  ;;  %v1367_v33 = vpop.permute.xlu1 %1366  ;;  %v140_v34 = vsel %vm2570_vm10, %v1353_v20, %v1358_v13  ;;  %v1362_v39 = vpop.permute.xlu0 %1361  ;;  %v2631_v46 = vsel %vm1923_vm4, 4294967295, %v2630_v46 }
  0x88   :  { %v1192_v36 = vpack.c.bf16 %v143_v30, %v142_v32  ;;  %v1369_v37 = vunpack.i.h.bf16 %v1367_v33  ;;  %v1368_v38 = vunpack.i.l.bf16 %v1367_v33  ;;  %v1364_v42 = vunpack.i.h.bf16 %v1362_v39 }
  0x89   :  { %v1363_v43 = vunpack.i.l.bf16 %v1362_v39  ;;  %1151 = vmatpush1.bf16.msk.msra.mxu0 %vm2571_vm13, %v1150_v27  ;;  %v167_v45 = vpack.c.bf16 %v141_v40, %v140_v34  ;;  %vm2576_vm10 = vcmp.lt.s32.totalorder %v1808_v29, 15  ;;  %vm1936_vm13 = vmand %vm1810_vm1, %vm2575_vm5  ;;  %vm2582_vm14 = vcmp.lt.s32.totalorder %v1802_v26, 15 }
  0x8a   :  { %v194_v47 = vsel %vm2581_vm15, %v1364_v42, %v1369_v37  ;;  %v2633_v51 = vsel %vm1936_vm13, 4294967295, %v2632_v51  ;;  %vm1950_vm3 = vmand %vm1818_vm6, %vm2576_vm10 }
  0x8b   :  { %v193_v48 = vsel %vm2581_vm15, %v1363_v43, %v1368_v38  ;;  %582 = vmatprep.subr.bf16.mxu1 %v167_v45  ;;  %v1377_v50 = vpop.permute.xlu1 %1376  ;;  %v1372_v56 = vpop.permute.xlu0 %1371  ;;  %v2635_v59 = vsel %vm1950_vm3, 4294967295, %v2634_v59  ;;  %vm2579_vm5 = vmpackc.low %vm1936_vm13, %vm1936_vm13  ;;  %v271_v45 = vpack.c.bf16 %v1737_v9, %v1732_v8  ;;  %v273_v9 = vpack.c.bf16 %v1725_v6, %v1720_v5 }
  0x8c   :  { %v1153_v52 = vpack.c.bf16 %v194_v47, %v193_v48  ;;  %1193 = vmatpush1.bf16.msk.msra.mxu1 %vm2574_vm0, %v1192_v36  ;;  %v1379_v54 = vunpack.i.h.bf16 %v1377_v50  ;;  %v1378_v55 = vunpack.i.l.bf16 %v1377_v50  ;;  %v1374_v57 = vunpack.i.h.bf16 %v1372_v56  ;;  %vm1973_vm10 = vmpackc.low %vm2582_vm14, %vm2582_vm14 }
  0x8d   :  { %v1373_v58 = vunpack.i.l.bf16 %v1372_v56  ;;  %vm2580_vm0 = vcmp.lt.s32.totalorder %v1786_v17, 1  ;;  %v2637_v11 = vsel %vm1973_vm10, 4294967295, %v2636_v11  ;;  %vm2578_vm7 = vmpackc.low %vm1950_vm3, %vm1950_vm3  ;;  %v272_v6 = vpack.c.bf16 %v1703_v1, %v1698_v0 }
  0x8e   :  { %v195_v60 = vsel %vm2581_vm15, %v1378_v55, %v1363_v43  ;;  %v196_v61 = vsel %vm2581_vm15, %v1379_v54, %v1364_v42  ;;  %1154 = vmatprep.subr.msk.bf16.mxu0 %vm1923_vm4, %v1153_v52  ;;  %v190_v63 = vsel %vm2581_vm15, %v1374_v57, %v1379_v54  ;;  %v192_v3 = vsel %vm2581_vm15, %v1369_v37, %v1374_v57 }
  0x8f   :  { %v1156_v62 = vpack.c.bf16 %v196_v61, %v195_v60  ;;  %v189_v7 = vsel %vm2581_vm15, %v1373_v58, %v1378_v55  ;;  %v1387_v10 = vpop.permute.xlu1 %1386  ;;  %v191_v12 = vsel %vm2581_vm15, %v1368_v38, %v1373_v58  ;;  %v1382_v16 = vpop.permute.xlu0 %1381  ;;  %v270_v60 = vpack.c.bf16 %v1715_v4, %v1708_v2 }
  0x90   :  { %v1195_v13 = vpack.c.bf16 %v190_v63, %v189_v7  ;;  %v1389_v14 = vunpack.i.h.bf16 %v1387_v10  ;;  %v1388_v15 = vunpack.i.l.bf16 %v1387_v10  ;;  %v1198_v20 = vpack.c.bf16 %v192_v3, %v191_v12 }
  0x91   :  { %v1384_v21 = vunpack.i.h.bf16 %v1382_v16  ;;  %v1383_v24 = vunpack.i.l.bf16 %v1382_v16  ;;  %1157 = vmatpush1.bf16.msk.msra.mxu0 %vm2579_vm5, %v1156_v62  ;;  %vm2066_vm14 = vcmp.lt.s32.totalorder %v37_v22, 240  ;;  %vm2656_vm13 = vcmp.ge.s32.totalorder %v1806_v28, 1 }
  0x92   :  { %1196 = vmatprep.subr.msk.bf16.mxu1 %vm1973_vm10, %v1195_v13 }
  0x93   :  { %v243_v27 = vsel %vm2580_vm0, %v1384_v21, %v1389_v14  ;;  %v242_v30 = vsel %vm2580_vm0, %v1383_v24, %v1388_v15  ;;  %1199 = vmatpush1.bf16.msk.msra.mxu1 %vm2578_vm7, %v1198_v20  ;;  %v1397_v32 = vpop.permute.xlu1 %1396  ;;  %v1392_v37 = vpop.permute.xlu0 %1391  ;;  %vm2007_vm7 = vmpackc.low %vm50_vm2, %vm50_vm2  ;;  %vm2640_vm2 = vcmp.ge.s32.totalorder %v1808_v29, 1 }
  0x94   :  { %v1159_v33 = vpack.c.bf16 %v243_v27, %v242_v30  ;;  %v1399_v34 = vunpack.i.h.bf16 %v1397_v32  ;;  %v1398_v36 = vunpack.i.l.bf16 %v1397_v32  ;;  %v1394_v38 = vunpack.i.h.bf16 %v1392_v37  ;;  %vm2024_vm5 = vmpackc.low %vm2640_vm2, %vm2640_vm2 }
  0x95   :  { %v1393_v39 = vunpack.i.l.bf16 %v1392_v37  ;;  %vm2583_vm2 = vcmp.lt.s32.totalorder %v1786_v17, 127 }
  0x96   :  { %v244_v40 = vsel %vm2580_vm0, %v1398_v36, %v1383_v24  ;;  %v245_v42 = vsel %vm2580_vm0, %v1399_v34, %v1384_v21  ;;  %1160 = vmatprep.subr.msk.bf16.mxu0 %vm1862_vm12, %v1159_v33  ;;  %v239_v48 = vsel %vm2580_vm0, %v1394_v38, %v1399_v34  ;;  %v241_v50 = vsel %vm2580_vm0, %v1389_v14, %v1394_v38 }
  0x97   :  { %v1162_v47 = vpack.c.bf16 %v245_v42, %v244_v40  ;;  %v238_v52 = vsel %vm2580_vm0, %v1393_v39, %v1398_v36  ;;  %v1407_v54 = vpop.permute.xlu1 %1406  ;;  %v240_v55 = vsel %vm2580_vm0, %v1388_v15, %v1393_v39  ;;  %v1402_v57 = vpop.permute.xlu0 %1401  ;;  %vm2643_vm0 = vcmp.lt.s32.totalorder %v1808_v29, 15 }
  0x98   :  { %v1201_v56 = vpack.c.bf16 %v239_v48, %v238_v52  ;;  %v1204_v58 = vpack.c.bf16 %v241_v50, %v240_v55  ;;  %v1409_v61 = vunpack.i.h.bf16 %v1407_v54  ;;  %v1408_v62 = vunpack.i.l.bf16 %v1407_v54  ;;  %vm2060_vm15 = vmpackc.low %vm2643_vm0, %vm2643_vm0 }
  0x99   :  { %1163 = vmatpush1.bf16.msk.msra.mxu0 %vm2007_vm7, %v1162_v47  ;;  %v1404_v63 = vunpack.i.h.bf16 %v1402_v57  ;;  %v1403_v3 = vunpack.i.l.bf16 %v1402_v57  ;;  %v2646_v34 = vmov 0  ;;  %vm2081_vm0 = vcmp.lt.s32.totalorder %v35_v23, 240 }
  0x9a   :  { %1202 = vmatprep.subr.msk.bf16.mxu1 %vm1834_vm9, %v1201_v56  ;;  %545 = vmatprep.subr.bf16.mxu0 %v271_v45  ;;  %v2647_v34 = vsel %vm2066_vm14, 4294967295, %v2646_v34  ;;  %v2652_v18 = vsel %vm2081_vm0, 4294967295, %v2651_v18 }
  0x9b   :  { %1205 = vmatpush1.bf16.msk.msra.mxu1 %vm2024_vm5, %v1204_v58  ;;  %v1417_v5 = vpop.permute.xlu1 %1416  ;;  %v1412_v2 = vpop.permute.xlu0 %1411  ;;  %v300_v13 = vsel %vm2583_vm2, %v1404_v63, %v1409_v61  ;;  %v299_v14 = vsel %vm2583_vm2, %v1403_v3, %v1408_v62 }
  0x9c   :  { %v1419_v7 = vunpack.i.h.bf16 %v1417_v5  ;;  %v1418_v10 = vunpack.i.l.bf16 %v1417_v5  ;;  %588 = vmatprep.subr.bf16.mxu1 %v273_v9  ;;  %v1414_v4 = vunpack.i.h.bf16 %v1412_v2  ;;  %v1413_v12 = vunpack.i.l.bf16 %v1412_v2 }
  0x9d   :  { %546 = vmatpush1.bf16.msra.mxu0 %v270_v60  ;;  %v1168_v36 = vpack.c.bf16 %v300_v13, %v299_v14 }
  0x9e   :  { %v301_v15 = vsel %vm2583_vm2, %v1418_v10, %v1403_v3  ;;  %v302_v16 = vsel %vm2583_vm2, %v1419_v7, %v1404_v63  ;;  %v296_v1 = vsel %vm2583_vm2, %v1414_v4, %v1419_v7  ;;  %v298_v20 = vsel %vm2583_vm2, %v1409_v61, %v1414_v4 }
  0x9f   :  { %v1207_v0 = vpack.c.bf16 %v302_v16, %v301_v15  ;;  %v295_v21 = vsel %vm2583_vm2, %v1413_v12, %v1418_v10  ;;  %589 = vmatpush1.bf16.msra.mxu1 %v272_v6  ;;  %v1427_v24 = vpop.permute.xlu1 %1426  ;;  %v297_v27 = vsel %vm2583_vm2, %v1408_v62, %v1413_v12  ;;  %v1422_v32 = vpop.permute.xlu0 %1421  ;;  %vm2648_vm2 = vcmp.lt.s32.totalorder %v1798_v25, 15 }
  0xa0   :  { %v1210_v30 = vpack.c.bf16 %v296_v1, %v295_v21  ;;  %v1165_v37 = vpack.c.bf16 %v298_v20, %v297_v27  ;;  %vm2075_vm3 = vmpackc.low %vm2648_vm2, %vm2648_vm2  ;;  %v1429_v22 = vunpack.i.h.bf16 %v1427_v24  ;;  %v1428_v38 = vunpack.i.l.bf16 %v1427_v24 }
  0xa1   :  { %1208 = vmatprep.subr.msk.bf16.mxu1 %vm1973_vm10, %v1207_v0  ;;  %v1424_v39 = vunpack.i.h.bf16 %v1422_v32  ;;  %v1423_v40 = vunpack.i.l.bf16 %v1422_v32  ;;  %vm2653_vm2 = vcmp.ge.s32.totalorder %v1802_v26, 1 }
  0xa2   :  { %1166 = vmatprep.subr.msk.bf16.mxu0 %vm1923_vm4, %v1165_v37  ;;  %vm2094_vm10 = vmand %vm2066_vm14, %vm2653_vm2  ;;  %vm2659_vm2 = vcmp.lt.s32.totalorder %v1786_v17, 113 }
  0xa3   :  { %1211 = vmatpush1.bf16.msk.msra.mxu1 %vm2060_vm15, %v1210_v30  ;;  %v1437_v25 = vpop.permute.xlu1 %1436  ;;  %1169 = vmatpush1.bf16.msk.msra.mxu0 %vm2075_vm3, %v1168_v36  ;;  %v1432_v45 = vpop.permute.xlu0 %1431  ;;  %vm2104_vm4 = vmand %vm2081_vm0, %vm2656_vm13  ;;  %v349_v52 = vsel %vm2659_vm2, %v1424_v39, %v1429_v22 }
  0xa4   :  { %v1439_v23 = vunpack.i.h.bf16 %v1437_v25  ;;  %v1438_v42 = vunpack.i.l.bf16 %v1437_v25  ;;  %v1434_v47 = vunpack.i.h.bf16 %v1432_v45  ;;  %v1433_v48 = vunpack.i.l.bf16 %v1432_v45  ;;  %vm2660_vm6 = vmmov %vm2659_vm2 }
  0xa5   :  { %v348_v54 = vsel %vm2660_vm6, %v1423_v40, %v1428_v38  ;;  %vm2661_vm1 = vmmov %vm2659_vm2 }
  0xa6   :  { %v350_v55 = vsel %vm2661_vm1, %v1438_v42, %v1423_v40  ;;  %vm2662_vm11 = vmmov %vm2661_vm1  ;;  %v346_v62 = vsel %vm2661_vm1, %v1428_v38, %v1433_v48  ;;  %v1174_v5 = vpack.c.bf16 %v349_v52, %v348_v54  ;;  %v2667_v52 = vmov 0 }
  0xa7   :  { %v351_v56 = vsel %vm2662_vm11, %v1439_v23, %v1424_v39  ;;  %vm2608_vm8 = vmpackc.low %vm2094_vm10, %vm2094_vm10  ;;  %v1447_v61 = vpop.permute.xlu1 %1446  ;;  %v1442_v3 = vpop.permute.xlu0 %1441 }
  0xa8   :  { %v1213_v57 = vpack.c.bf16 %v351_v56, %v350_v55  ;;  %vm2663_vm13 = vmmov %vm2661_vm1  ;;  %v1449_v7 = vunpack.i.h.bf16 %v1447_v61  ;;  %v1448_v10 = vunpack.i.l.bf16 %v1447_v61  ;;  %v1444_v2 = vunpack.i.h.bf16 %v1442_v3 }
  0xa9   :  { %v345_v9 = vsel %vm2663_vm13, %v1434_v47, %v1439_v23  ;;  %vm2664_vm9 = vmmov %vm2661_vm1  ;;  %v1443_v4 = vunpack.i.l.bf16 %v1442_v3 }
  0xaa   :  { %v347_v58 = vsel %vm2664_vm9, %v1429_v22, %v1434_v47  ;;  %vm2665_vm2 = vmmov %vm2661_vm1  ;;  %1214 = vmatprep.subr.msk.bf16.mxu1 %vm2608_vm8, %v1213_v57  ;;  %vm2604_vm9 = vcmp.lt.s32.totalorder %v1786_v17, 112  ;;  %vm2666_vm1 = vcmp.lt.s32.totalorder %v1802_v26, 15 }
  0xab   :  { %v344_v60 = vsel %vm2665_vm2, %v1433_v48, %v1438_v42  ;;  %vm2609_vm6 = vmpackc.low %vm2104_vm4, %vm2104_vm4  ;;  %v1171_v6 = vpack.c.bf16 %v347_v58, %v346_v62  ;;  %v1457_v12 = vpop.permute.xlu1 %1456  ;;  %v1452_v15 = vpop.permute.xlu0 %1451  ;;  %v397_v21 = vsel %vm2604_vm9, %v1443_v4, %v1448_v10  ;;  %v398_v24 = vsel %vm2604_vm9, %v1444_v2, %v1449_v7 }
  0xac   :  { %v1216_v63 = vpack.c.bf16 %v345_v9, %v344_v60  ;;  %v1459_v13 = vunpack.i.h.bf16 %v1457_v12  ;;  %v1458_v14 = vunpack.i.l.bf16 %v1457_v12  ;;  %v1454_v16 = vunpack.i.h.bf16 %v1452_v15  ;;  %vm2602_vm11 = vmpackc.low %vm2066_vm14, %vm2066_vm14 }
  0xad   :  { %1172 = vmatprep.subr.msk.bf16.mxu0 %vm2609_vm6, %v1171_v6  ;;  %v1453_v0 = vunpack.i.l.bf16 %v1452_v15  ;;  %vm2603_vm13 = vmpackc.low %vm2081_vm0, %vm2081_vm0  ;;  %v417_v40 = vpack.c.bf16 %v398_v24, %v397_v21  ;;  %vm2607_vm2 = vcmp.lt.s32.totalorder %v1786_v17, 111  ;;  %v2670_v58 = vmov 0 }
  0xae   :  { %1217 = vmatpush1.bf16.msk.msra.mxu1 %vm2024_vm5, %v1216_v63  ;;  %1175 = vmatpush1.bf16.msk.msra.mxu0 %vm2007_vm7, %v1174_v5  ;;  %v399_v1 = vsel %vm2604_vm9, %v1458_v14, %v1443_v4  ;;  %v400_v20 = vsel %vm2604_vm9, %v1459_v13, %v1444_v2  ;;  %v396_v30 = vsel %vm2604_vm9, %v1449_v7, %v1454_v16  ;;  %v1642_v2 = vld [vmem:[%s2560_s1] ss:$8 sps:$4 sm:$0xff]  }
  0xaf   :  { %v1219_v27 = vpack.c.bf16 %v400_v20, %v399_v1  ;;  %v395_v32 = vsel %vm2604_vm9, %v1448_v10, %v1453_v0  ;;  %v1467_v36 = vpop.permute.xlu1 %1466  ;;  %v393_v37 = vsel %vm2604_vm9, %v1453_v0, %v1458_v14  ;;  %v1462_v38 = vpop.permute.xlu0 %1461  ;;  %v394_v39 = vsel %vm2604_vm9, %v1454_v16, %v1459_v13 }
  0xb0   :  { %v1177_v22 = vpack.c.bf16 %v396_v30, %v395_v32  ;;  %v419_v25 = vpack.c.bf16 %v394_v39, %v393_v37  ;;  %v1469_v23 = vunpack.i.h.bf16 %v1467_v36  ;;  %v1468_v42 = vunpack.i.l.bf16 %v1467_v36 }
  0xb1   :  { %1220 = vmatprep.subr.msk.bf16.mxu1 %vm2602_vm11, %v1219_v27  ;;  %v1464_v45 = vunpack.i.h.bf16 %v1462_v38  ;;  %v1463_v47 = vunpack.i.l.bf16 %v1462_v38  ;;  %vm2182_vm11 = vmand %vm2066_vm14, %vm2666_vm1 }
  0xb2   :  { %1178 = vmatprep.subr.msk.bf16.mxu0 %vm2603_vm13, %v1177_v22  ;;  %595 = vmatpush1.bf16.msra.mxu1 %v419_v25  ;;  %v2668_v52 = vsel %vm2182_vm11, 4294967295, %v2667_v52  ;;  %vm2669_vm13 = vcmp.lt.s32.totalorder %v1806_v28, 15  ;;  %vm2605_vm1 = vmpackc.low %vm2182_vm11, %vm2182_vm11 }
  0xb3   :  { %552 = vmatpush1.bf16.msra.mxu0 %v417_v40  ;;  %v1477_v48 = vpop.permute.xlu1 %1476  ;;  %v1472_v56 = vpop.permute.xlu0 %1471  ;;  %vm2190_vm9 = vmand %vm2081_vm0, %vm2669_vm13  ;;  %v447_v26 = vsel %vm2607_vm2, %v1464_v45, %v1469_v23  ;;  %v446_v60 = vsel %vm2607_vm2, %v1463_v47, %v1468_v42 }
  0xb4   :  { %v1479_v54 = vunpack.i.h.bf16 %v1477_v48  ;;  %v1478_v55 = vunpack.i.l.bf16 %v1477_v48  ;;  %v1474_v57 = vunpack.i.h.bf16 %v1472_v56  ;;  %v1473_v9 = vunpack.i.l.bf16 %v1472_v56  ;;  %vm2606_vm13 = vmpackc.low %vm2190_vm9, %vm2190_vm9 }
  0xb5   :  { %v2671_v58 = vsel %vm2190_vm9, 4294967295, %v2670_v58  ;;  %v1183_v4 = vpack.c.bf16 %v447_v26, %v446_v60 }
  0xb6   :  { %v448_v61 = vsel %vm2607_vm2, %v1478_v55, %v1463_v47  ;;  %v449_v62 = vsel %vm2607_vm2, %v1479_v54, %v1464_v45  ;;  %v443_v63 = vsel %vm2607_vm2, %v1474_v57, %v1479_v54  ;;  %v445_v3 = vsel %vm2607_vm2, %v1469_v23, %v1474_v57 }
  0xb7   :  { %v1222_v28 = vpack.c.bf16 %v449_v62, %v448_v61  ;;  %v442_v5 = vsel %vm2607_vm2, %v1473_v9, %v1478_v55  ;;  %v444_v6 = vsel %vm2607_vm2, %v1468_v42, %v1473_v9 }
  0xb8   :  { %v1225_v7 = vpack.c.bf16 %v443_v63, %v442_v5  ;;  %v1180_v10 = vpack.c.bf16 %v445_v3, %v444_v6  ;;  %v997_v63 = vld [vmem:[%s2563_s4] sm:$0xff]  ;;  %v998_v3 = vld [vmem:[%s2563_s4 + $0x8] sm:$0xff] }
  0xb9   :  { %1223 = vmatprep.subr.msk.bf16.mxu1 %vm2605_vm1, %v1222_v28  ;;  %v1645_v28 = vld [vmem:[%s2562_s3 + $0x4] ss:$8 sps:$4 sm:$0xff]   ;;  %vm2672_vm1 = vcmask 130048  }
  0xba   :  { %1226 = vmatpush1.bf16.msk.msra.mxu1 %vm2060_vm15, %v1225_v7  ;;  %1181 = vmatprep.subr.msk.bf16.mxu0 %vm2606_vm13, %v1180_v10  ;;  %vm2673_vm13 = vmmov %vm2672_vm1 }
  0xbb   :  { %1184 = vmatpush1.bf16.msk.msra.mxu0 %vm2075_vm3, %v1183_v4 }
  0xbd   :  { %613 = vmatmul.mubr.bf16.vlgmr.msra.gmra.mrb[0].mxu1 %v1642_v2 }
  0xbe   :  { %570 = vmatmul.mubr.bf16.vlgmr.msra.gmra.mrb[0].mxu0 %v1642_v2  ;;  %1142 = vmatprep.mubr.msk.bf16.mxu1 %vm2673_vm13, %v1645_v28 }
  0xbf   :  { %1141 = vmatprep.mubr.msk.bf16.mxu0 %vm2672_vm1, %v1645_v28  ;;  %vm2674_vm1 = vcmp.lt.s32.totalorder %v1786_v17, 17 }
  0xc0   :  { %vm2675_vm13 = vmmov %vm2674_vm1 }
  0xc1   :  { %vm2676_vm2 = vmmov %vm2674_vm1 }
  0xc2   :  { %vm2677_vm8 = vmmov %vm2674_vm1 }
  0xc3   :  { %vm2679_vm6 = vmmov %vm2674_vm1 }
  0xc4   :  { %v517_v12 = vpop.permute.xlu0 %516  ;;  %v522_v14 = vpop.permute.xlu1 %521  ;;  %vm2680_vm11 = vmmov %vm2674_vm1 }
 0x190   :  { %v614_v13 = vpop.f32.mrb[0].mxu1 }
 0x191   :  { %v615_v15 = vadd.f32 %v614_v13, %v517_v12  ;;  %v616_v16 = vpop.f32.mrb[1].mxu1  ;;  %v571_v0 = vpop.f32.mrb[0].mxu0 }
 0x192   :  { %v617_v1 = vadd.f32 %v616_v16, %v517_v12  ;;  %v618_v20 = vpop.f32.mrb[2].mxu1  ;;  %v572_v21 = vadd.f32 %v571_v0, %v517_v12  ;;  %v573_v27 = vpop.f32.mrb[1].mxu0 }
 0x193   :  { %v625_v24 = vmax.f32 %v615_v15, 0.0  ;;  %v619_v30 = vadd.f32 %v618_v20, %v522_v14  ;;  %v620_v32 = vpop.f32.mrb[3].mxu1  ;;  %v574_v36 = vadd.f32 %v573_v27, %v517_v12  ;;  %v575_v22 = vpop.f32.mrb[2].mxu0 }
 0x194   :  { %v626_v37 = vmax.f32 %v617_v1, 0.0  ;;  %v621_v38 = vadd.f32 %v620_v32, %v522_v14  ;;  %v576_v39 = vadd.f32 %v575_v22, %v522_v14  ;;  %v577_v25 = vpop.f32.mrb[3].mxu0  ;;  %v623_v23 = vmax.f32 %v572_v21, 0.0 }
 0x195   :  { %v629_v40 = vmax.f32 %v619_v30, 0.0  ;;  %v624_v42 = vmax.f32 %v574_v36, 0.0  ;;  %v578_v45 = vadd.f32 %v577_v25, %v522_v14 }
 0x196   :  { %v630_v47 = vmax.f32 %v621_v38, 0.0  ;;  %v627_v48 = vmax.f32 %v576_v39, 0.0 }
 0x197   :  { %v1487_v54 = vpack.i.bf16 %v629_v40, %v625_v24  ;;  %v628_v55 = vmax.f32 %v578_v45, 0.0  ;;  %v2243_v62 = vpack.c.bf16 %v629_v40, %v625_v24 }
 0x198   :  { %v1567_v56 = vpack.i.bf16 %v630_v47, %v626_v37  ;;  %v1482_v57 = vpack.i.bf16 %v627_v48, %v623_v23  ;;  %v2238_v60 = vpack.c.bf16 %v630_v47, %v626_v37  ;;  %v2241_v61 = vpack.c.bf16 %v627_v48, %v623_v23 }
 0x199   :  { %v1562_v9 = vpack.i.bf16 %v628_v55, %v624_v42  ;;  %v2236_v26 = vpack.c.bf16 %v628_v55, %v624_v42 }
 0x19a   :  { %1483 = vrot.lane.b32.xlu1 %v1482_v57, %s1656_s9 }
 0x19b   :  { %1563 = vrot.lane.b32.xlu0 %v1562_v9, %s1656_s9 }
 0x19e   :  { %1488 = vrot.lane.b32.xlu1 %v1487_v54, %s1656_s9 }
 0x19f   :  { %1568 = vrot.lane.b32.xlu0 %v1567_v56, %s1656_s9 }
 0x1a2   :  { %1493 = vrot.lane.b32.xlu1 %v1482_v57, %s1657_s10 }
 0x1a3   :  { %1573 = vrot.lane.b32.xlu0 %v1562_v9, %s1657_s10 }
 0x1a6   :  { %1498 = vrot.lane.b32.xlu1 %v1487_v54, %s1657_s10 }
 0x1a7   :  { %1578 = vrot.lane.b32.xlu0 %v1567_v56, %s1657_s10 }
 0x1aa   :  { %1503 = vrot.lane.b32.xlu1 %v1482_v57, %s1658_s11 }
 0x1ab   :  { %1583 = vrot.lane.b32.xlu0 %v1562_v9, %s1658_s11 }
 0x1ae   :  { %1508 = vrot.lane.b32.xlu1 %v1487_v54, %s1658_s11 }
 0x1af   :  { %1588 = vrot.lane.b32.xlu0 %v1567_v56, %s1658_s11 }
 0x1b2   :  { %1513 = vrot.lane.b32.xlu1 %v1482_v57, %s1659_s12 }
 0x1b3   :  { %1593 = vrot.lane.b32.xlu0 %v1562_v9, %s1659_s12 }
 0x1b6   :  { %1518 = vrot.lane.b32.xlu1 %v1487_v54, %s1659_s12 }
 0x1b7   :  { %1598 = vrot.lane.b32.xlu0 %v1567_v56, %s1659_s12 }
 0x1ba   :  { %1523 = vrot.lane.b32.xlu1 %v1482_v57, %s1660_s13 }
 0x1bb   :  { %1603 = vrot.lane.b32.xlu0 %v1562_v9, %s1660_s13 }
 0x1be   :  { %1528 = vrot.lane.b32.xlu1 %v1487_v54, %s1660_s13 }
 0x1bf   :  { %1608 = vrot.lane.b32.xlu0 %v1567_v56, %s1660_s13 }
 0x1c2   :  { %1533 = vrot.lane.b32.xlu1 %v1482_v57, %s1661_s14 }
 0x1c3   :  { %1613 = vrot.lane.b32.xlu0 %v1562_v9, %s1661_s14 }
 0x1c6   :  { %1538 = vrot.lane.b32.xlu1 %v1487_v54, %s1661_s14 }
 0x1c7   :  { %1618 = vrot.lane.b32.xlu0 %v1567_v56, %s1661_s14 }
 0x1ca   :  { %1543 = vrot.lane.b32.xlu1 %v1482_v57, %s1662_s15 }
 0x1cb   :  { %1623 = vrot.lane.b32.xlu0 %v1562_v9, %s1662_s15 }
 0x1ce   :  { %1548 = vrot.lane.b32.xlu1 %v1487_v54, %s1662_s15 }
 0x1cf   :  { %1628 = vrot.lane.b32.xlu0 %v1567_v56, %s1662_s15 }
 0x1d2   :  { %1553 = vrot.lane.b32.xlu1 %v1482_v57, %s1663_s16 }
 0x1d3   :  { %1633 = vrot.lane.b32.xlu0 %v1562_v9, %s1663_s16 }
 0x1d6   :  { %1558 = vrot.lane.b32.xlu1 %v1487_v54, %s1663_s16 }
 0x1d7   :  { %1638 = vrot.lane.b32.xlu0 %v1567_v56, %s1663_s16 }
 0x1da   :  { %1001 = vperm.xlu1 %1481, %v997_v63  }
 0x1db   :  { %1006 = vperm.xlu0 %1480, %v998_v3  }
 0x20c   :  { %v1484_v5 = vpop.permute.xlu1 %1483 }
 0x20d   :  { %v1486_v6 = vunpack.i.h.bf16 %v1484_v5  ;;  %v1485_v7 = vunpack.i.l.bf16 %v1484_v5  ;;  %v1564_v10 = vpop.permute.xlu0 %1563 }
 0x20e   :  { %v1566_v2 = vunpack.i.h.bf16 %v1564_v10  ;;  %v1565_v4 = vunpack.i.l.bf16 %v1564_v10 }
 0x210   :  { %v651_v12 = vsel %vm2674_vm1, %v1485_v7, %v1565_v4  ;;  %v652_v13 = vsel %vm2675_vm13, %v1486_v6, %v1566_v2  ;;  %v1489_v14 = vpop.permute.xlu1 %1488  ;;  %vm2678_vm13 = vmmov %vm2674_vm1 }
 0x211   :  { %v1228_v15 = vpack.c.bf16 %v652_v13, %v651_v12  ;;  %v1491_v16 = vunpack.i.h.bf16 %v1489_v14  ;;  %v1490_v0 = vunpack.i.l.bf16 %v1489_v14  ;;  %v1569_v1 = vpop.permute.xlu0 %1568 }
 0x212   :  { %v1571_v20 = vunpack.i.h.bf16 %v1569_v1  ;;  %v1570_v21 = vunpack.i.l.bf16 %v1569_v1 }
 0x213   :  { %v650_v24 = vsel %vm2676_vm2, %v1566_v2, %v1491_v16  ;;  %v649_v27 = vsel %vm2677_vm8, %v1565_v4, %v1490_v0  ;;  %1229 = vmatprep.subr.msk.bf16.mxu0 %vm1862_vm12, %v1228_v15  ;;  %vm2681_vm8 = vnez %v2625_v44  ;;  %vm2682_vm2 = vnez %v2623_v41 }
 0x214   :  { %v647_v30 = vsel %vm2674_vm1, %v1490_v0, %v1570_v21  ;;  %v648_v32 = vsel %vm2678_vm13, %v1491_v16, %v1571_v20  ;;  %v653_v36 = vsel %vm2679_vm6, %v1570_v21, %v1485_v7  ;;  %v1494_v37 = vpop.permute.xlu1 %1493  ;;  %v654_v22 = vsel %vm2680_vm11, %v1571_v20, %v1486_v6  ;;  %vm2683_vm6 = vmpackc.low %vm2682_vm2, %vm2682_vm2 }
 0x215   :  { %v1270_v38 = vpack.c.bf16 %v648_v32, %v647_v30  ;;  %v1496_v39 = vunpack.i.h.bf16 %v1494_v37  ;;  %v1495_v40 = vunpack.i.l.bf16 %v1494_v37  ;;  %v1574_v25 = vpop.permute.xlu0 %1573  ;;  %v1273_v23 = vpack.c.bf16 %v650_v24, %v649_v27 }
 0x216   :  { %v1231_v42 = vpack.c.bf16 %v654_v22, %v653_v36  ;;  %v1576_v45 = vunpack.i.h.bf16 %v1574_v25  ;;  %v1575_v47 = vunpack.i.l.bf16 %v1574_v25  ;;  %vm2684_vm11 = vnez %v2627_v49 }
 0x217   :  { %1271 = vmatprep.subr.msk.bf16.mxu1 %vm2681_vm8, %v1270_v38  ;;  %vm2685_vm1 = vmpackc.low %vm2684_vm11, %vm2684_vm11  ;;  %vm2686_vm13 = vcmp.lt.s32.totalorder %v1786_v17, 16 }
 0x218   :  { %1232 = vmatpush1.bf16.msk.msra.mxu0 %vm2683_vm6, %v1231_v42  ;;  %v1499_v48 = vpop.permute.xlu1 %1498  ;;  %1274 = vmatpush1.bf16.msk.msra.mxu1 %vm2685_vm1, %v1273_v23  ;;  %v691_v54 = vsel %vm2686_vm13, %v1495_v40, %v1575_v47  ;;  %vm2687_vm9 = vmmov %vm2686_vm13 }
 0x219   :  { %v692_v55 = vsel %vm2687_vm9, %v1496_v39, %v1576_v45  ;;  %v1501_v56 = vunpack.i.h.bf16 %v1499_v48  ;;  %v1500_v57 = vunpack.i.l.bf16 %v1499_v48  ;;  %v1579_v9 = vpop.permute.xlu0 %1578  ;;  %vm2688_vm2 = vmmov %vm2687_vm9 }
 0x21a   :  { %v704_v28 = vpack.c.bf16 %v692_v55, %v691_v54  ;;  %v1581_v41 = vunpack.i.h.bf16 %v1579_v9  ;;  %v1580_v63 = vunpack.i.l.bf16 %v1579_v9  ;;  %vm2689_vm6 = vmmov %vm2688_vm2 }
 0x21b   :  { %v690_v3 = vsel %vm2688_vm2, %v1576_v45, %v1501_v56  ;;  %v689_v49 = vsel %vm2689_vm6, %v1575_v47, %v1500_v57  ;;  %vm2690_vm11 = vmmov %vm2688_vm2 }
 0x21c   :  { %1023 = vmatprep.subr.bf16.mxu0 %v704_v28  ;;  %v693_v5 = vsel %vm2690_vm11, %v1580_v63, %v1495_v40  ;;  %vm2691_vm1 = vmmov %vm2688_vm2  ;;  %v1504_v7 = vpop.permute.xlu1 %1503  ;;  %v1276_v1 = vpack.c.bf16 %v690_v3, %v689_v49  ;;  %vm2694_vm2 = vnez %v2619_v31  ;;  %vm2696_vm11 = vcmp.lt.s32.totalorder %v1786_v17, 15 }
 0x21d   :  { %v694_v6 = vsel %vm2691_vm1, %v1581_v41, %v1496_v39  ;;  %vm2692_vm9 = vmmov %vm2691_vm1  ;;  %v1506_v4 = vunpack.i.h.bf16 %v1504_v7  ;;  %v1505_v12 = vunpack.i.l.bf16 %v1504_v7  ;;  %v1584_v13 = vpop.permute.xlu0 %1583 }
 0x21e   :  { %v687_v10 = vsel %vm2692_vm9, %v1500_v57, %v1580_v63  ;;  %v1234_v2 = vpack.c.bf16 %v694_v6, %v693_v5  ;;  %vm2693_vm13 = vmmov %vm2691_vm1  ;;  %v1586_v15 = vunpack.i.h.bf16 %v1584_v13  ;;  %v1585_v16 = vunpack.i.l.bf16 %v1584_v13 }
 0x21f   :  { %v688_v14 = vsel %vm2693_vm13, %v1501_v56, %v1581_v41  ;;  %vm2695_vm6 = vmpackc.low %vm2694_vm2, %vm2694_vm2  ;;  %vm2698_vm9 = vnez %v2621_v35 }
 0x220   :  { %v706_v0 = vpack.c.bf16 %v688_v14, %v687_v10  ;;  %1235 = vmatpush1.bf16.msk.msra.mxu0 %vm2695_vm6, %v1234_v2  ;;  %v731_v20 = vsel %vm2696_vm11, %v1505_v12, %v1585_v16  ;;  %vm2697_vm1 = vmmov %vm2696_vm11  ;;  %v1509_v24 = vpop.permute.xlu1 %1508  ;;  %vm2702_vm11 = vnez %v2631_v46 }
 0x221   :  { %v732_v21 = vsel %vm2697_vm1, %v1506_v4, %v1586_v15  ;;  %v1511_v30 = vunpack.i.h.bf16 %v1509_v24  ;;  %v1510_v32 = vunpack.i.l.bf16 %v1509_v24  ;;  %vm2699_vm13 = vmpackc.low %vm2698_vm9, %vm2698_vm9  ;;  %v1589_v31 = vpop.permute.xlu0 %1588 }
 0x222   :  { %1066 = vmatprep.subr.bf16.mxu1 %v706_v0  ;;  %v1237_v27 = vpack.c.bf16 %v732_v21, %v731_v20  ;;  %v1591_v36 = vunpack.i.h.bf16 %v1589_v31  ;;  %v1590_v37 = vunpack.i.l.bf16 %v1589_v31  ;;  %vm2700_vm2 = vmmov %vm2697_vm1 }
 0x223   :  { %1277 = vmatpush1.bf16.msk.msra.mxu1 %vm2699_vm13, %v1276_v1  ;;  %v730_v22 = vsel %vm2700_vm2, %v1586_v15, %v1511_v30  ;;  %vm2701_vm6 = vmmov %vm2697_vm1  ;;  %vm2706_vm2 = vnez %v2637_v11 }
 0x224   :  { %v729_v38 = vsel %vm2701_vm6, %v1585_v16, %v1510_v32  ;;  %1238 = vmatprep.subr.msk.bf16.mxu0 %vm2702_vm11, %v1237_v27  ;;  %v727_v39 = vsel %vm2697_vm1, %v1510_v32, %v1590_v37  ;;  %vm2703_vm14 = vmmov %vm2697_vm1  ;;  %v1514_v25 = vpop.permute.xlu1 %1513 }
 0x225   :  { %v728_v35 = vsel %vm2703_vm14, %v1511_v30, %v1591_v36  ;;  %vm2704_vm9 = vmmov %vm2697_vm1  ;;  %v1516_v45 = vunpack.i.h.bf16 %v1514_v25  ;;  %v1515_v47 = vunpack.i.l.bf16 %v1514_v25  ;;  %v1594_v48 = vpop.permute.xlu0 %1593  ;;  %v1282_v54 = vpack.c.bf16 %v730_v22, %v729_v38 }
 0x226   :  { %v733_v40 = vsel %vm2704_vm9, %v1590_v37, %v1505_v12  ;;  %vm2705_vm13 = vmmov %vm2697_vm1  ;;  %v1279_v42 = vpack.c.bf16 %v728_v35, %v727_v39  ;;  %v1596_v56 = vunpack.i.h.bf16 %v1594_v48  ;;  %v1595_v57 = vunpack.i.l.bf16 %v1594_v48 }
 0x227   :  { %v734_v23 = vsel %vm2705_vm13, %v1591_v36, %v1506_v4  ;;  %vm2707_vm14 = vcmp.lt.s32.totalorder %v1786_v17, 1  ;;  %vm2709_vm1 = vnez %v2633_v51  ;;  %vm2711_vm13 = vnez %v2635_v59 }
 0x228   :  { %v1240_v55 = vpack.c.bf16 %v734_v23, %v733_v40  ;;  %1280 = vmatprep.subr.msk.bf16.mxu1 %vm2706_vm2, %v1279_v42  ;;  %v771_v9 = vsel %vm2707_vm14, %v1515_v47, %v1595_v57  ;;  %vm2708_vm6 = vmmov %vm2707_vm14  ;;  %v1519_v41 = vpop.permute.xlu1 %1518 }
 0x229   :  { %v772_v28 = vsel %vm2708_vm6, %v1516_v45, %v1596_v56  ;;  %vm2710_vm9 = vmpackc.low %vm2709_vm1, %vm2709_vm1  ;;  %v1521_v3 = vunpack.i.h.bf16 %v1519_v41  ;;  %v1520_v49 = vunpack.i.l.bf16 %v1519_v41  ;;  %v1599_v5 = vpop.permute.xlu0 %1598 }
 0x22a   :  { %1241 = vmatpush1.bf16.msk.msra.mxu0 %vm2710_vm9, %v1240_v55  ;;  %vm2712_vm0 = vmpackc.low %vm2711_vm13, %vm2711_vm13  ;;  %v1243_v63 = vpack.c.bf16 %v772_v28, %v771_v9  ;;  %v1601_v6 = vunpack.i.h.bf16 %v1599_v5  ;;  %v1600_v7 = vunpack.i.l.bf16 %v1599_v5 }
 0x22b   :  { %1283 = vmatpush1.bf16.msk.msra.mxu1 %vm2712_vm0, %v1282_v54  ;;  %vm2713_vm14 = vmmov %vm2708_vm6  ;;  %v769_v51 = vsel %vm2708_vm6, %v1595_v57, %v1520_v49 }
 0x22c   :  { %v770_v10 = vsel %vm2713_vm14, %v1596_v56, %v1521_v3  ;;  %1244 = vmatprep.subr.msk.bf16.mxu0 %vm1862_vm12, %v1243_v63  ;;  %vm2714_vm1 = vmmov %vm2708_vm6  ;;  %v1524_v12 = vpop.permute.xlu1 %1523  ;;  %vm2718_vm12 = vcmp.lt.s32.totalorder %v1786_v17, 127 }
 0x22d   :  { %v767_v59 = vsel %vm2714_vm1, %v1520_v49, %v1600_v7  ;;  %vm2715_vm0 = vmmov %vm2714_vm1  ;;  %v1288_v13 = vpack.c.bf16 %v770_v10, %v769_v51  ;;  %v1526_v16 = vunpack.i.h.bf16 %v1524_v12  ;;  %v1604_v0 = vpop.permute.xlu0 %1603  ;;  %v1525_v53 = vunpack.i.l.bf16 %v1524_v12 }
 0x22e   :  { %v768_v2 = vsel %vm2715_vm0, %v1521_v3, %v1601_v6  ;;  %vm2716_vm9 = vmmov %vm2715_vm0  ;;  %v1606_v20 = vunpack.i.h.bf16 %v1604_v0  ;;  %v1605_v21 = vunpack.i.l.bf16 %v1604_v0 }
 0x22f   :  { %v773_v4 = vsel %vm2716_vm9, %v1600_v7, %v1515_v47  ;;  %vm2717_vm13 = vmmov %vm2715_vm0  ;;  %v1285_v15 = vpack.c.bf16 %v768_v2, %v767_v59 }
 0x230   :  { %v774_v14 = vsel %vm2717_vm13, %v1601_v6, %v1516_v45  ;;  %v1529_v24 = vpop.permute.xlu1 %1528  ;;  %v819_v31 = vsel %vm2718_vm12, %v1525_v53, %v1605_v21  ;;  %vm2719_vm14 = vmmov %vm2718_vm12 }
 0x231   :  { %v1246_v1 = vpack.c.bf16 %v774_v14, %v773_v4  ;;  %1286 = vmatprep.subr.msk.bf16.mxu1 %vm2681_vm8, %v1285_v15  ;;  %v1531_v27 = vunpack.i.h.bf16 %v1529_v24  ;;  %v1530_v30 = vunpack.i.l.bf16 %v1529_v24  ;;  %v1609_v32 = vpop.permute.xlu0 %1608  ;;  %v820_v44 = vsel %vm2719_vm14, %v1526_v16, %v1606_v20  ;;  %vm2720_vm8 = vmmov %vm2718_vm12 }
 0x232   :  { %1289 = vmatpush1.bf16.msk.msra.mxu1 %vm2024_vm5, %v1288_v13  ;;  %v1611_v36 = vunpack.i.h.bf16 %v1609_v32  ;;  %v1610_v37 = vunpack.i.l.bf16 %v1609_v32  ;;  %vm2721_vm6 = vmmov %vm2720_vm8  ;;  %v1252_v25 = vpack.c.bf16 %v820_v44, %v819_v31  ;;  %vm2726_vm12 = vcmp.lt.s32.totalorder %v1786_v17, 113 }
 0x233   :  { %1247 = vmatpush1.bf16.msk.msra.mxu0 %vm2007_vm7, %v1246_v1  ;;  %1072 = vmatprep.subr.bf16.mxu1 %v2238_v60  ;;  %v818_v22 = vsel %vm2720_vm8, %v1606_v20, %v1531_v27  ;;  %v817_v38 = vsel %vm2721_vm6, %v1605_v21, %v1530_v30  ;;  %vm2722_vm1 = vmmov %vm2721_vm6 }
 0x234   :  { %1029 = vmatprep.subr.bf16.mxu0 %v2236_v26  ;;  %v1249_v39 = vpack.c.bf16 %v818_v22, %v817_v38  ;;  %v815_v26 = vsel %vm2722_vm1, %v1530_v30, %v1610_v37  ;;  %vm2723_vm0 = vmmov %vm2722_vm1  ;;  %v1534_v40 = vpop.permute.xlu1 %1533 }
 0x235   :  { %v816_v60 = vsel %vm2723_vm0, %v1531_v27, %v1611_v36  ;;  %vm2724_vm9 = vmmov %vm2723_vm0  ;;  %v1536_v45 = vunpack.i.h.bf16 %v1534_v40  ;;  %v1614_v47 = vpop.permute.xlu0 %1613  ;;  %v1535_v54 = vunpack.i.l.bf16 %v1534_v40 }
 0x236   :  { %v821_v35 = vsel %vm2724_vm9, %v1610_v37, %v1525_v53  ;;  %vm2725_vm13 = vmmov %vm2723_vm0  ;;  %v1294_v42 = vpack.c.bf16 %v816_v60, %v815_v26  ;;  %1073 = vmatpush1.bf16.msra.mxu1 %v2243_v62  ;;  %v1616_v55 = vunpack.i.h.bf16 %v1614_v47  ;;  %v1615_v56 = vunpack.i.l.bf16 %v1614_v47 }
 0x237   :  { %1030 = vmatpush1.bf16.msra.mxu0 %v2241_v61  ;;  %v822_v23 = vsel %vm2725_vm13, %v1611_v36, %v1526_v16  ;;  %vm2727_vm14 = vmmov %vm2726_vm12 }
 0x238   :  { %v1291_v48 = vpack.c.bf16 %v822_v23, %v821_v35  ;;  %1250 = vmatprep.subr.msk.bf16.mxu0 %vm2702_vm11, %v1249_v39  ;;  %v1539_v61 = vpop.permute.xlu1 %1538  ;;  %v859_v28 = vsel %vm2726_vm12, %v1535_v54, %v1615_v56  ;;  %v860_v46 = vsel %vm2727_vm14, %v1536_v45, %v1616_v55  ;;  %vm2728_vm11 = vmmov %vm2726_vm12  ;;  %vm2736_vm12 = vcmp.lt.s32.totalorder %v1786_v17, 112 }
 0x239   :  { %v1541_v57 = vunpack.i.h.bf16 %v1539_v61  ;;  %v1540_v9 = vunpack.i.l.bf16 %v1539_v61  ;;  %v1619_v62 = vpop.permute.xlu0 %1618  ;;  %v1258_v51 = vpack.c.bf16 %v860_v46, %v859_v28  ;;  %vm2734_vm9 = vmpackc.low %vm2104_vm4, %vm2104_vm4 }
 0x23a   :  { %1292 = vmatprep.subr.msk.bf16.mxu1 %vm2706_vm2, %v1291_v48  ;;  %v1621_v41 = vunpack.i.h.bf16 %v1619_v62  ;;  %v1620_v63 = vunpack.i.l.bf16 %v1619_v62  ;;  %vm2729_vm2 = vmmov %vm2728_vm11 }
 0x23b   :  { %1253 = vmatpush1.bf16.msk.msra.mxu0 %vm2075_vm3, %v1252_v25  ;;  %1295 = vmatpush1.bf16.msk.msra.mxu1 %vm2060_vm15, %v1294_v42  ;;  %v858_v3 = vsel %vm2728_vm11, %v1616_v55, %v1541_v57  ;;  %v857_v11 = vsel %vm2729_vm2, %v1615_v56, %v1540_v9  ;;  %vm2730_vm8 = vmmov %vm2729_vm2 }
 0x23c   :  { %v1255_v49 = vpack.c.bf16 %v858_v3, %v857_v11  ;;  %v855_v5 = vsel %vm2730_vm8, %v1540_v9, %v1620_v63  ;;  %vm2731_vm6 = vmmov %vm2729_vm2  ;;  %v1544_v10 = vpop.permute.xlu1 %1543  ;;  %vm2744_vm8 = vnez %v2652_v18 }
 0x23d   :  { %v856_v6 = vsel %vm2731_vm6, %v1541_v57, %v1621_v41  ;;  %vm2732_vm1 = vmmov %vm2729_vm2  ;;  %v1546_v4 = vunpack.i.h.bf16 %v1544_v10  ;;  %v1624_v12 = vpop.permute.xlu0 %1623  ;;  %v1545_v14 = vunpack.i.l.bf16 %v1544_v10 }
 0x23e   :  { %v861_v7 = vsel %vm2732_vm1, %v1620_v63, %v1535_v54  ;;  %vm2733_vm0 = vmmov %vm2732_vm1  ;;  %v1300_v2 = vpack.c.bf16 %v856_v6, %v855_v5  ;;  %v1626_v15 = vunpack.i.h.bf16 %v1624_v12  ;;  %v1625_v16 = vunpack.i.l.bf16 %v1624_v12  ;;  %1256 = vmatprep.subr.msk.bf16.mxu0 %vm2734_vm9, %v1255_v49  ;;  %v1647_v63 = vld [vmem:[%s2562_s3] ss:$8 sps:$4 sm:$0xff]  }
 0x23f   :  { %v862_v59 = vsel %vm2733_vm0, %v1621_v41, %v1536_v45  ;;  %1259 = vmatpush1.bf16.msk.msra.mxu0 %vm2007_vm7, %v1258_v51  ;;  %vm2735_vm13 = vmpackc.low %vm2094_vm10, %vm2094_vm10  ;;  %vm2746_vm1 = vnez %v2647_v34  ;;  %vm2748_vm9 = vcmp.lt.s32.totalorder %v1786_v17, 111 }
 0x240   :  { %v1297_v13 = vpack.c.bf16 %v862_v59, %v861_v7  ;;  %v1549_v0 = vpop.permute.xlu1 %1548  ;;  %v899_v50 = vsel %vm2736_vm12, %v1545_v14, %v1625_v16  ;;  %vm2737_vm4 = vmmov %vm2736_vm12  ;;  %v1648_v7 = vld [vmem:[%s2559_s0] sm:$0xff] }
 0x241   :  { %v1551_v1 = vunpack.i.h.bf16 %v1549_v0  ;;  %v1550_v53 = vunpack.i.l.bf16 %v1549_v0  ;;  %v1629_v20 = vpop.permute.xlu0 %1628  ;;  %v900_v43 = vsel %vm2737_vm4, %v1546_v4, %v1626_v15  ;;  %vm2738_vm7 = vmmov %vm2737_vm4 }
 0x242   :  { %1298 = vmatprep.subr.msk.bf16.mxu1 %vm2735_vm13, %v1297_v13  ;;  %v1631_v21 = vunpack.i.h.bf16 %v1629_v20  ;;  %v1630_v24 = vunpack.i.l.bf16 %v1629_v20  ;;  %vm2739_vm10 = vmmov %vm2737_vm4  ;;  %v911_v36 = vpack.c.bf16 %v900_v43, %v899_v50 }
 0x243   :  { %1301 = vmatpush1.bf16.msk.msra.mxu1 %vm2024_vm5, %v1300_v2  ;;  %v898_v19 = vsel %vm2738_vm7, %v1626_v15, %v1551_v1  ;;  %v897_v27 = vsel %vm2739_vm10, %v1625_v16, %v1550_v53  ;;  %vm2740_vm14 = vmmov %vm2737_vm4  ;;  %v1649_v2 = vld [vmem:[%s2559_s0 + $0x8] sm:$0xff]  ;;  %v1650_v16 = vld [vmem:[%s2559_s0 + $0x10] sm:$0xff] }
 0x244   :  { %v1261_v30 = vpack.c.bf16 %v898_v19, %v897_v27  ;;  %v895_v8 = vsel %vm2740_vm14, %v1550_v53, %v1630_v24  ;;  %vm2741_vm5 = vmmov %vm2737_vm4  ;;  %v1554_v44 = vpop.permute.xlu1 %1553  ;;  %v1653_v19 = vld [vmem:[%s2559_s0 + $0x28] sm:$0xff] }
 0x245   :  { %v896_v32 = vsel %vm2741_vm5, %v1551_v1, %v1631_v21  ;;  %vm2742_vm11 = vmmov %vm2737_vm4  ;;  %v1556_v38 = vunpack.i.h.bf16 %v1554_v44  ;;  %v1634_v39 = vpop.permute.xlu0 %1633  ;;  %v1555_v60 = vunpack.i.l.bf16 %v1554_v44  ;;  %v1651_v1 = vld [vmem:[%s2559_s0 + $0x20] sm:$0xff] }
 0x246   :  { %v901_v31 = vsel %vm2742_vm11, %v1630_v24, %v1545_v14  ;;  %vm2743_vm2 = vmmov %vm2737_vm4  ;;  %v913_v22 = vpack.c.bf16 %v896_v32, %v895_v8  ;;  %v1636_v35 = vunpack.i.h.bf16 %v1634_v39  ;;  %v1635_v40 = vunpack.i.l.bf16 %v1634_v39 }
 0x247   :  { %v902_v37 = vsel %vm2743_vm2, %v1631_v21, %v1546_v4  ;;  %vm2745_vm6 = vmpackc.low %vm2744_vm8, %vm2744_vm8  ;;  %vm2756_vm11 = vnez %v2671_v58  ;;  %vm2758_vm8 = vnez %v2668_v52  ;;  %v1652_v21 = vld [vmem:[%s2559_s0 + $0x18] sm:$0xff] }
 0x248   :  { %v1303_v26 = vpack.c.bf16 %v902_v37, %v901_v31  ;;  %1262 = vmatprep.subr.msk.bf16.mxu0 %vm2745_vm6, %v1261_v30  ;;  %vm2747_vm0 = vmpackc.low %vm2746_vm1, %vm2746_vm1  ;;  %v1559_v25 = vpop.permute.xlu1 %1558  ;;  %v939_v47 = vsel %vm2748_vm9, %v1555_v60, %v1635_v40  ;;  %v1654_v31 = vld [vmem:[%s2559_s0 + $0x30] sm:$0xff] }
 0x249   :  { %1036 = vmatpush1.bf16.msra.mxu0 %v911_v36  ;;  %v1561_v23 = vunpack.i.h.bf16 %v1559_v25  ;;  %v1560_v42 = vunpack.i.l.bf16 %v1559_v25  ;;  %v1639_v45 = vpop.permute.xlu0 %1638  ;;  %vm2749_vm13 = vmmov %vm2748_vm9 }
 0x24a   :  { %1304 = vmatprep.subr.msk.bf16.mxu1 %vm2747_vm0, %v1303_v26  ;;  %v940_v18 = vsel %vm2749_vm13, %v1556_v38, %v1636_v35  ;;  %v1641_v48 = vunpack.i.h.bf16 %v1639_v45  ;;  %v1640_v54 = vunpack.i.l.bf16 %v1639_v45  ;;  %vm2750_vm12 = vmmov %vm2748_vm9 }
 0x24b   :  { %1079 = vmatpush1.bf16.msra.mxu1 %v913_v22  ;;  %v938_v55 = vsel %vm2750_vm12, %v1636_v35, %v1561_v23  ;;  %vm2751_vm4 = vmmov %vm2748_vm9  ;;  %v1267_v62 = vpack.c.bf16 %v940_v18, %v939_v47  ;;  %v1655_v22 = vld [vmem:[%s2559_s0 + $0x38] sm:$0xff] }
 0x24c   :  { %v937_v34 = vsel %vm2751_vm4, %v1635_v40, %v1560_v42  ;;  %vm2752_vm7 = vmmov %vm2751_vm4 }
 0x24d   :  { %v1264_v56 = vpack.c.bf16 %v938_v55, %v937_v34  ;;  %v935_v61 = vsel %vm2752_vm7, %v1560_v42, %v1640_v54  ;;  %vm2753_vm10 = vmmov %vm2751_vm4 }
 0x24e   :  { %v936_v57 = vsel %vm2753_vm10, %v1561_v23, %v1641_v48  ;;  %vm2754_vm14 = vmmov %vm2751_vm4 }
 0x24f   :  { %v941_v9 = vsel %vm2754_vm14, %v1640_v54, %v1555_v60  ;;  %vm2755_vm5 = vmmov %vm2751_vm4  ;;  %v1309_v46 = vpack.c.bf16 %v936_v57, %v935_v61 }
 0x250   :  { %v942_v28 = vsel %vm2755_vm5, %v1641_v48, %v1556_v38  ;;  %vm2757_vm2 = vmpackc.low %vm2756_vm11, %vm2756_vm11 }
 0x251   :  { %v1306_v41 = vpack.c.bf16 %v942_v28, %v941_v9  ;;  %1265 = vmatprep.subr.msk.bf16.mxu0 %vm2757_vm2, %v1264_v56  ;;  %vm2759_vm6 = vmpackc.low %vm2758_vm8, %vm2758_vm8 }
 0x252   :  { %1268 = vmatpush1.bf16.msk.msra.mxu0 %vm2075_vm3, %v1267_v62 }
 0x253   :  { %1307 = vmatprep.subr.msk.bf16.mxu1 %vm2759_vm6, %v1306_v41 }
 0x254   :  { %1310 = vmatpush1.bf16.msk.msra.mxu1 %vm2060_vm15, %v1309_v46 }
 0x255   :  { %1054 = vmatmul.mubr.bf16.vlgmr.msra.gmra.mrb[4].mxu0 %v1647_v63 }
 0x257   :  { %1097 = vmatmul.mubr.bf16.vlgmr.msra.gmra.mrb[4].mxu1 %v1647_v63 }
 0x259   :  { %v1002_v17 = vpop.permute.xlu1 %1001 }
 0x25a   :  { %v1007_v3 = vpop.permute.xlu0 %1006 }
 0x328   :  { %v1055_v58 = vpop.f32.mrb[4].mxu0 }
 0x329   :  { %v1056_v11 = vadd.f32 %v1055_v58, %v1002_v17  ;;  %v1057_v49 = vpop.f32.mrb[5].mxu0 }
 0x32a   :  { %v1058_v5 = vadd.f32 %v1057_v49, %v1002_v17  ;;  %v1098_v6 = vpop.f32.mrb[4].mxu1  ;;  %v1059_v29 = vpop.f32.mrb[6].mxu0 }
 0x32b   :  { %v1107_v52 = vadd.f32 %v1648_v7, %v1056_v11  ;;  %v1099_v10 = vadd.f32 %v1098_v6, %v1002_v17  ;;  %v1060_v51 = vadd.f32 %v1059_v29, %v1007_v3  ;;  %v1100_v59 = vpop.f32.mrb[5].mxu1  ;;  %v1061_v33 = vpop.f32.mrb[7].mxu0 }
 0x32c   :  { %v1108_v4 = vadd.f32 %v1649_v2, %v1058_v5  ;;  %v1101_v12 = vadd.f32 %v1100_v59, %v1002_v17  ;;  %v1062_v13 = vadd.f32 %v1061_v33, %v1007_v3  ;;  %v1102_v14 = vpop.f32.mrb[6].mxu1 }
 0x32d   :  { %v1115_v15 = vmax.f32 %v1107_v52, 0.0  ;;  %v1109_v0 = vadd.f32 %v1650_v16, %v1099_v10  ;;  %v1111_v53 = vadd.f32 %v1651_v1, %v1060_v51  ;;  %v1103_v20 = vadd.f32 %v1102_v14, %v1007_v3  ;;  %v1104_v50 = vpop.f32.mrb[7].mxu1 }
 0x32e   :  { %v1116_v43 = vmax.f32 %v1108_v4, 0.0  ;;  %v1110_v24 = vadd.f32 %v1652_v21, %v1101_v12  ;;  %v1112_v27 = vadd.f32 %v1653_v19, %v1062_v13  ;;  %v1105_v30 = vadd.f32 %v1104_v50, %v1007_v3 }
 0x32f   :  { %1123 = vst [vmem:[%s2564_s5] sm:$0xff] %v1115_v15  ;;  %v1117_v8 = vmax.f32 %v1109_v0, 0.0  ;;  %v1119_v32 = vmax.f32 %v1111_v53, 0.0  ;;  %v1113_v44 = vadd.f32 %v1654_v31, %v1103_v20 }
 0x330   :  { %1124 = vst [vmem:[%s2564_s5 + $0x8] sm:$0xff] %v1116_v43  ;;  %v1118_v36 = vmax.f32 %v1110_v24, 0.0  ;;  %v1120_v37 = vmax.f32 %v1112_v27, 0.0  ;;  %v1114_v38 = vadd.f32 %v1655_v22, %v1105_v30 }
 0x331   :  { %1125 = vst [vmem:[%s2564_s5 + $0x10] sm:$0xff] %v1117_v8  ;;  %1127 = vst [vmem:[%s2564_s5 + $0x20] sm:$0xff] %v1119_v32  ;;  %v1121_v39 = vmax.f32 %v1113_v44, 0.0 }
 0x332   :  { %1126 = vst [vmem:[%s2564_s5 + $0x18] sm:$0xff] %v1118_v36  ;;  %1128 = vst [vmem:[%s2564_s5 + $0x28] sm:$0xff] %v1120_v37  ;;  %v1122_v26 = vmax.f32 %v1114_v38, 0.0 }
 0x333   :  { %1129 = vst [vmem:[%s2564_s5 + $0x30] sm:$0xff] %v1121_v39 }
 0x334   :  { %1130 = vst [vmem:[%s2564_s5 + $0x38] sm:$0xff] %v1122_v26 }

</bundles_post_ra>
